<compile_context>
chip_gen: v7x
topology: tpu7x:2x2x1
jax: 0.10.0
libtpu: 0.0.40
codegen_flags: <defaults>
</compile_context>

<pallas_src>
import math
from functools import reduce
from operator import mul

import jax
import jax.numpy as jnp
from jax.experimental import pallas as pl
from jax.experimental.pallas import tpu as pltpu


def _vpt_linear_rows_kernel(x_ref, w_ref, b_ref, o_ref):
    """One grid step == one (row-tile, col-tile) of the flattened (B*N, D) map.

    x_ref : (TM, D)   row tile of the kept (non-prompt) tokens, input dtype
    w_ref : (D, TN)   stand-in `layer` weight column tile, compute dtype
    b_ref : (1, TN)   stand-in `layer` bias column tile, compute dtype
    o_ref : (TM, TN)  output tile, out dtype
    """
    # In-kernel cast (f32 -> bf16 when compute_dtype=bf16) rides spare VPU
    # slots under the MXU; no extra HBM traffic.
    xv = x_ref[...].astype(w_ref.dtype)
    acc = jnp.dot(xv, w_ref[...], preferred_element_type=jnp.float32)
    o_ref[...] = (acc + b_ref[...].astype(jnp.float32)).astype(o_ref.dtype)


def _choose_row_tile(m, max_tile=512, min_steps=4):
    """Largest (8,128)-friendly row tile <= max_tile that keeps >= min_steps grid steps."""
    for t in (1024, 512, 256, 128, 64, 32, 16, 8):
        if t <= max_tile and pl.cdiv(m, t) >= min_steps:
            return t
    return 8


def _choose_col_tile(d, w_bpe, resident_budget):
    """Full-D (resident weight) when it fits; otherwise a 128-multiple column tile."""
    if d * d * w_bpe <= resident_budget:
        return d
    for t in (1024, 512, 256, 128):
        if t < d and d % t == 0:
            return t
    return d


def _vmem_capacity_bytes():
    try:
        return int(pltpu.get_tpu_info().vmem_capacity_bytes)
    except Exception:
        return 64 << 20  # conservative fallback (v7x per-TensorCore size)


def simple_vpt_forward(idx, x, prompt_embeddings, w, bias, num_tokens,
                       batch_first=True, cls_token=True,
                       compute_dtype=None, out_dtype=None,
                       row_tile=512, col_tile=None):
    """Pallas forward of SimpleVPT with a per-token linear stand-in for `layer`.

    `idx` / `prompt_embeddings` select the prompt rows that the reference
    forward concatenates and then discards after the per-token layer; they do
    not affect the returned slice, so no compute or DMA is spent on them.
    """
    del cls_token                      # unused in the reference forward too
    del idx, prompt_embeddings         # output-dead for a per-token `layer` (see header)

    if not batch_first:
        x = jnp.transpose(x, (1, 0, 2))
    B, N, D = x.shape
    out_dtype = x.dtype if out_dtype is None else jnp.dtype(out_dtype)

    # Only the small resident operands are cast in the wrapper; x stays in its
    # HBM dtype and is cast inside the kernel.
    if compute_dtype is not None:
        w = w.astype(compute_dtype)
        bias = bias.astype(compute_dtype)

    # Fold batch into the matmul M dimension: (B, N, D) -> (B*N, D).
    M = B * N
    x2 = x.reshape(M, D)

    x_bpe = jnp.dtype(x2.dtype).itemsize
    w_bpe = jnp.dtype(w.dtype).itemsize
    out_bpe = jnp.dtype(out_dtype).itemsize

    # Generation-aware scoped-VMEM ceiling with headroom (v7x: ~56 MiB of its
    # 64 MiB; v5e/v6e: ~120 MiB of 128 MiB).
    cap = max(_vmem_capacity_bytes() - (8 << 20), 16 << 20)

    tm = _choose_row_tile(M, row_tile)
    if col_tile is None:
        tn = _choose_col_tile(D, w_bpe, resident_budget=cap // 4)
    else:
        tn = int(col_tile)
        assert D % tn == 0 and (tn == D or tn % 128 == 0), "bad col_tile"

    grid = (pl.cdiv(M, tm), D // tn)
    weight_resident = (tn == D)   # same W/bias block every step -> single-buffer

    # VMEM budget: double-buffered x/out tiles, weight+bias blocks (bias padded
    # to 8 sublanes), plus an f32 result tile of internal scratch.
    est_vmem = (2 * tm * D * x_bpe
                + 2 * tm * tn * out_bpe
                + 2 * (D + 8) * tn * w_bpe
                + tm * tn * 4)
    vmem_limit = int(min(max(est_vmem + (4 << 20), 16 << 20), cap))

    cost = pl.CostEstimate(
        flops=2 * M * D * D,
        transcendentals=0,
        bytes_accessed=M * D * x_bpe + (D * D + D) * w_bpe + M * D * out_bpe)

    def _build(single_buffer_w):
        wb_kwargs = ({"pipeline_mode": pl.Buffered(1)}
                     if (single_buffer_w and weight_resident) else {})
        return pl.pallas_call(
            _vpt_linear_rows_kernel,
            out_shape=jax.ShapeDtypeStruct((M, D), out_dtype),
            grid=grid,
            in_specs=[
                # kept-token rows: one lane-dense (tm, D) tile per row step
                pl.BlockSpec((tm, D), lambda i, j: (i, 0)),
                # layer weight / bias: constant block when tn == D
                pl.BlockSpec((D, tn), lambda i, j: (0, j), **wb_kwargs),
                pl.BlockSpec((1, tn), lambda i, j: (0, j), **wb_kwargs),
            ],
            out_specs=pl.BlockSpec((tm, tn), lambda i, j: (i, j)),
            compiler_params=pltpu.CompilerParams(
                dimension_semantics=("parallel", "parallel"),
                vmem_limit_bytes=vmem_limit),
            cost_estimate=cost,
        )

    try:
        out = _build(True)(x2, w, bias)
    except Exception:
        # Fallback if pipeline_mode=pl.Buffered(1) is rejected by this runtime;
        # identical kernel with default (double) buffering for W/bias.
        out = _build(False)(x2, w, bias)

    out = out.reshape(B, N, D)
    if not batch_first:
        out = jnp.transpose(out, (1, 0, 2))
    return out


if __name__ == "__main__":
    # Module hyper-parameters (small but tile-friendly: B*N = 512 rows -> four
    # 128-row grid steps; D = 256 lanes).
    embed_dim, depth, num_tokens = 256, 3, 8
    B, N = 2, 256
    idx = 1

    key = jax.random.PRNGKey(0)
    k_prompt, k_w, k_b, k_x = jax.random.split(key, 4)

    # nn.init.uniform_(prompt_embeddings, -val, val) with the module's `val`.
    val = math.sqrt(6.0 / float(3 * reduce(mul, (16, 16), 1) + embed_dim))
    prompt_embeddings = jax.random.uniform(
        k_prompt, (depth, num_tokens, embed_dim), jnp.float32, -val, val)

    # Deterministic stand-in `layer` parameters.
    w = jax.random.normal(k_w, (embed_dim, embed_dim), jnp.float32) * 0.02
    bias = jax.random.normal(k_b, (1, embed_dim), jnp.float32) * 0.02
    x = jax.random.normal(k_x, (B, N, embed_dim), jnp.float32)

    # Ground-truth reference = the module's exact forward with the per-token
    # linear stand-in: concat(prompt, x) -> linear -> drop the prompt rows.
    full = jnp.concatenate(
        [jnp.broadcast_to(prompt_embeddings[idx], (B, num_tokens, embed_dim)), x],
        axis=1)
    ref = jnp.einsum("bnd,de->bne", full, w,
                     precision=jax.lax.Precision.HIGHEST) + bias[0]
    ref = ref[:, num_tokens:, :]

    # ---- f32 path (tolerance covers MXU default f32 passes vs HIGHEST ref) ----
    out = simple_vpt_forward(idx, x, prompt_embeddings, w, bias, num_tokens,
                             batch_first=True, cls_token=True)
    out = jax.block_until_ready(out)
    assert out.shape == (B, N, embed_dim)
    assert jnp.allclose(out, ref, atol=5e-3, rtol=5e-3), "f32 mismatch vs reference"

    # ---- column-tiled path (exercises the large-D plan at small D) ----
    out_ct = simple_vpt_forward(idx, x, prompt_embeddings, w, bias, num_tokens,
                                col_tile=128)
    out_ct = jax.block_until_ready(out_ct)
    assert jnp.allclose(out_ct, ref, atol=5e-3, rtol=5e-3), \
        "column-tiled mismatch vs reference"

    # ---- bf16-operand, bf16-output path (v6e/v7x fast path, f32 accumulate) ----
    out_bf16 = simple_vpt_forward(idx, x, prompt_embeddings, w, bias, num_tokens,
                                  compute_dtype=jnp.bfloat16,
                                  out_dtype=jnp.bfloat16)
    out_bf16 = jax.block_until_ready(out_bf16)
    ref_bf16 = (jnp.dot(x.reshape(-1, embed_dim).astype(jnp.bfloat16),
                        w.astype(jnp.bfloat16),
                        preferred_element_type=jnp.float32)
                + bias[0].astype(jnp.bfloat16).astype(jnp.float32)
                ).reshape(B, N, embed_dim)
    assert out_bf16.dtype == jnp.bfloat16
    assert jnp.allclose(out_bf16.astype(jnp.float32), ref_bf16,
                        atol=2e-2, rtol=2e-2), \
        "bf16 mismatch vs same-precision reference"

    print("KERNEL_OK")
</pallas_src>

<mosaic_0001>
module attributes {stable_mosaic.version = 11 : i64} {
  func.func @_vpt_linear_rows_kernel(%arg0: i32, %arg1: i32, %arg2: memref<128x256xf32, #tpu.memory_space<vmem>>, %arg3: memref<256x256xf32, #tpu.memory_space<vmem>>, %arg4: memref<1x256xf32, #tpu.memory_space<vmem>>, %arg5: memref<128x256xf32, #tpu.memory_space<vmem>>) attributes {dimension_semantics = [#tpu.dimension_semantics<parallel>, #tpu.dimension_semantics<parallel>], iteration_bounds = array<i64: 4, 1>, scalar_prefetch = 0 : i64, scratch_operands = 0 : i64, tpu.core_type = #tpu.core_type<tc>, window_params = [{transform_indices = @transform_0, window_bounds = array<i64: 128, 256>}, {pipeline_mode = #tpu.pipeline_mode<synchronous>, transform_indices = @transform_1, window_bounds = array<i64: 256, 256>}, {pipeline_mode = #tpu.pipeline_mode<synchronous>, transform_indices = @transform_2, window_bounds = array<i64: 1, 256>}, {transform_indices = @transform_3, window_bounds = array<i64: 128, 256>}]} {
    %c0 = arith.constant 0 : index
    %c0_0 = arith.constant 0 : index
    %0 = vector.load %arg2[%c0, %c0_0] : memref<128x256xf32, #tpu.memory_space<vmem>>, vector<128x256xf32>
    %c0_1 = arith.constant 0 : index
    %c0_2 = arith.constant 0 : index
    %1 = vector.load %arg3[%c0_1, %c0_2] : memref<256x256xf32, #tpu.memory_space<vmem>>, vector<256x256xf32>
    %cst = arith.constant dense<0.000000e+00> : vector<128x256xf32>
    %2 = tpu.matmul %0, %1, %cst {dimension_numbers = #tpu.dot_dimension_numbers<[1], [0], [0], [1], [0, 0, 1, 1], [], []>} : vector<128x256xf32>, vector<256x256xf32>, vector<128x256xf32> -> vector<128x256xf32>
    %c0_3 = arith.constant 0 : index
    %c0_4 = arith.constant 0 : index
    %3 = vector.load %arg4[%c0_3, %c0_4] : memref<1x256xf32, #tpu.memory_space<vmem>>, vector<1x256xf32>
    %4 = vector.broadcast %3 : vector<1x256xf32> to vector<128x256xf32>
    %5 = arith.addf %2, %4 : vector<128x256xf32>
    %c0_5 = arith.constant 0 : index
    %c0_6 = arith.constant 0 : index
    %6 = vector.load %arg5[%c0_5, %c0_6] : memref<128x256xf32, #tpu.memory_space<vmem>>, vector<128x256xf32>
    tpu.vector_store %arg5[%c0_5, %c0_6], %5 {strides = array<i32>} : memref<128x256xf32, #tpu.memory_space<vmem>>, vector<128x256xf32>,
    return
  }
  func.func @transform_0(%arg0: i32, %arg1: i32) -> (i32, i32) {
    %c0_i32 = arith.constant 0 : i32
    %c0_i32_0 = arith.constant 0 : i32
    return %arg0, %c0_i32 : i32, i32
  }
  func.func @transform_1(%arg0: i32, %arg1: i32) -> (i32, i32) {
    %c0_i32 = arith.constant 0 : i32
    %c0_i32_0 = arith.constant 0 : i32
    return %c0_i32, %arg1 : i32, i32
  }
  func.func @transform_2(%arg0: i32, %arg1: i32) -> (i32, i32) {
    %c0_i32 = arith.constant 0 : i32
    %c0_i32_0 = arith.constant 0 : i32
    return %c0_i32, %arg1 : i32, i32
  }
  func.func @transform_3(%arg0: i32, %arg1: i32) -> (i32, i32) {
    %c0_i32 = arith.constant 0 : i32
    return %arg0, %arg1 : i32, i32
  }
}

module attributes {stable_mosaic.version = 11 : i64} {
  func.func @_vpt_linear_rows_kernel(%arg0: i32, %arg1: i32, %arg2: memref<128x256xf32, #tpu.memory_space<vmem>>, %arg3: memref<256x256xf32, #tpu.memory_space<vmem>>, %arg4: memref<1x256xf32, #tpu.memory_space<vmem>>, %arg5: memref<128x256xf32, #tpu.memory_space<vmem>>) attributes {dimension_semantics = [#tpu.dimension_semantics<parallel>, #tpu.dimension_semantics<parallel>], iteration_bounds = array<i64: 4, 1>, scalar_prefetch = 0 : i64, scratch_operands = 0 : i64, tpu.core_type = #tpu.core_type<tc>, window_params = [{transform_indices = @transform_0, window_bounds = array<i64: 128, 256>}, {transform_indices = @transform_1, window_bounds = array<i64: 256, 256>}, {transform_indices = @transform_2, window_bounds = array<i64: 1, 256>}, {transform_indices = @transform_3, window_bounds = array<i64: 128, 256>}]} {
    %c0 = arith.constant 0 : index
    %c0_0 = arith.constant 0 : index
    %0 = vector.load %arg2[%c0, %c0_0] : memref<128x256xf32, #tpu.memory_space<vmem>>, vector<128x256xf32>
    %c0_1 = arith.constant 0 : index
    %c0_2 = arith.constant 0 : index
    %1 = vector.load %arg3[%c0_1, %c0_2] : memref<256x256xf32, #tpu.memory_space<vmem>>, vector<256x256xf32>
    %cst = arith.constant dense<0.000000e+00> : vector<128x256xf32>
    %2 = tpu.matmul %0, %1, %cst {dimension_numbers = #tpu.dot_dimension_numbers<[1], [0], [0], [1], [0, 0, 1, 1], [], []>} : vector<128x256xf32>, vector<256x256xf32>, vector<128x256xf32> -> vector<128x256xf32>
    %c0_3 = arith.constant 0 : index
    %c0_4 = arith.constant 0 : index
    %3 = vector.load %arg4[%c0_3, %c0_4] : memref<1x256xf32, #tpu.memory_space<vmem>>, vector<1x256xf32>
    %4 = vector.broadcast %3 : vector<1x256xf32> to vector<128x256xf32>
    %5 = arith.addf %2, %4 : vector<128x256xf32>
    %c0_5 = arith.constant 0 : index
    %c0_6 = arith.constant 0 : index
    %6 = vector.load %arg5[%c0_5, %c0_6] : memref<128x256xf32, #tpu.memory_space<vmem>>, vector<128x256xf32>
    tpu.vector_store %arg5[%c0_5, %c0_6], %5 {strides = array<i32>} : memref<128x256xf32, #tpu.memory_space<vmem>>, vector<128x256xf32>,
    return
  }
  func.func @transform_0(%arg0: i32, %arg1: i32) -> (i32, i32) {
    %c0_i32 = arith.constant 0 : i32
    %c0_i32_0 = arith.constant 0 : i32
    return %arg0, %c0_i32 : i32, i32
  }
  func.func @transform_1(%arg0: i32, %arg1: i32) -> (i32, i32) {
    %c0_i32 = arith.constant 0 : i32
    %c0_i32_0 = arith.constant 0 : i32
    return %c0_i32, %arg1 : i32, i32
  }
  func.func @transform_2(%arg0: i32, %arg1: i32) -> (i32, i32) {
    %c0_i32 = arith.constant 0 : i32
    %c0_i32_0 = arith.constant 0 : i32
    return %c0_i32, %arg1 : i32, i32
  }
  func.func @transform_3(%arg0: i32, %arg1: i32) -> (i32, i32) {
    %c0_i32 = arith.constant 0 : i32
    return %arg0, %arg1 : i32, i32
  }
}

</mosaic_0001>

<bundles_post_ra>
// kernel: tpu_custom_call.1
= control target key start
LH: loop header
LB: loop body
LE: loop exit
PB: predicated region body
PF: predicated region fallthrough
CT: control target
= control target key end

     0   :  { %8 = vsyncpa [#allocation3], 0  ;;  %s1381_s0 = inlined_call_operand.hbm [shape: f32[512,256], index: 0, kind: input, shape index: {}]   ;;  %s1382_s1 = inlined_call_operand.hbm [shape: f32[256,256], index: 1, kind: input, shape index: {}]   ;;  %s1383_s2 = inlined_call_operand.vmem [shape: f32[1,256], index: 2, kind: input, shape index: {}]   ;;  %s1384_s3 = inlined_call_operand.hbm [shape: f32[512,256], index: 3, kind: output, shape index: {}]  }
   0x1   :  { %10 = vsyncpa [#allocation3 + $0x1], 0 }
   0x2   :  { %11 = vsyncpa [#allocation6], 0 }
   0x3   :  { %12 = vsyncpa [#allocation4], 0 }
   0x4   :  { %14 = vsyncpa [#allocation4 + $0x1], 0  ;;  %s1046_s12 = smov 0   ;;  %s1048_s13 = smov 0  }
   0x5   :  { %s1050_s14 = smov 0   ;;  %s1052_s15 = smov 0  }
   0x6   :  { %s1054_s16 = smov 0   ;;  %s1056_s17 = smov 0  }
   0x7 LB: > { %s676_s18 = sadd.s32 4294967295, %s1017_s17   ;;  %s677_s19 = sadd.s32 4294967294, %s1017_s17   ;;  %s1017_s17 = sphi %s1056_s17, %s20_s17   ;;  %s1013_s16 = sphi %s1054_s16, %s1407_s16   ;;  %s1009_s15 = sphi %s1052_s15, %s1406_s15   ;;  %s1005_s14 = sphi %s1050_s14, %s1405_s14   ;;  %s1001_s13 = sphi %s1048_s13, %s1404_s13   ;;  %s997_s12 = sphi %s1046_s12, %s1403_s12  }
   0x8   : > { %p52_p0 = scmp.ne.s32.totalorder %s1001_s13, %s997_s12  ;;  %p1080_p1 = scmp.eq.s32.totalorder %s676_s18, 0 }
   0x9   : > { %p1084_p2 = scmp.eq.s32.totalorder %s676_s18, 3  ;;  %p136_p3 = scmp.eq.s32.totalorder %s677_s19, 3 }
   0xa   : > { %s1389_s20 = scalar_select %p1080_p1, 1, 0 }
   0xb   : > { %s1390_s21 = scalar_select %p1084_p2, 1, 0 }
   0xc   : > { %p1090_p4 = por %p1080_p1, %p52_p0  ;;  %p678_p5 = scmp.ge.s32.totalorder %s1017_s17, 1 }
   0xd   : > { %p1095_p6 = por %p136_p3, %p52_p0  ;;  %p143_p7 = scmp.lt.s32.totalorder %s1017_s17, 5 }
   0xe   : > { %s1391_s22 = scalar_select %p1090_p4, 1, 0 }
   0xf   : > { %s1392_s23 = scalar_select %p1095_p6, 1, 0 }
  0x10   : > { %p1100_p8 = pnand %p678_p5, %p143_p7  ;;  %s1019_s25 = smov [#allocation5]  }
  0x11   : > { %s158_s26 = sshll.u32 %s1019_s25, 4  ;;  %s32_s28 = sadd.s32 1, %s1013_s16  ;;  %s159_s26 = int_to_ptr.vmem [resolvable:$true] %s158_s26 }
  0x12   : > { %s1393_s24 = scalar_select %p1100_p8, 1, 0 }
  0x13   : > { %p804_p9 = pneg %p1100_p8  ;;  %s873_s4 = scalar_lea.hbm %s1382_s1, 8192 }
  0x14   : > { %p874_p11 = scmp.ne.s32.totalorder %s1382_s1, %s873_s4  ;;  %p880_p3 = scmp.lt.u32.totalorder %s873_s4, %s1382_s1 }
  0x15   : > { %p1108_p10 = pnand %p804_p9, %p1080_p1 }
  0x17   : > { %p875_p12 = pneg %p1108_p10 }
  0x19   : > { %p876_p13 = pnand %p875_p12, %p874_p11 }
  0x1b   : > { %p877_p0 = pneg %p876_p13 }
  0x1d   : > { %p882_p5 = pnand %p880_p3, %p877_p0 }
  0x1f   : > { %885 = shalt.err (!%p882_p5)
}
  0x20   : > { %s886_s9 = scalar_lea.vmem %s159_s26, 8192  ;;  %p894_p1 = scmp.lt.s32.totalorder %s159_s26, %s159_s26 }
  0x21   : > { %p887_p7 = scmp.ne.s32.totalorder %s159_s26, %s886_s9  ;;  %p895_p4 = scmp.lt.s32.totalorder %s886_s9, %s886_s9 }
  0x23   : > { %p889_p9 = pnand %p887_p7, %p875_p12  ;;  %p896_p8 = por %p895_p4, %p894_p1 }
  0x25   : > { %p890_p6 = pneg %p889_p9 }
  0x27   : > { %p897_p2 = pnand %p896_p8, %p890_p6 }
  0x29   : > { %900 = shalt.err (!%p897_p2)
}
  0x2a   : > { %s1020_s10 = smov 256   ;;  %s1021_s11 = smov 16  }
  0x2b   : > { %807 = dma.hbm_to_vmem [thread:$0]  (!%p1108_p10), %s1382_s1, 8192, %s159_s26, [#allocation6], %s1020_s10, %s1020_s10, %s1021_s11  }
  0x2c   : > { %p34_p1 = scmp.ge.s32.totalorder %s32_s28, 4  ;;  %s39_s25 = sadd.s32 1, %s1005_s14 }
  0x2d   : > { %p46_p2 = scmp.ne.s32.totalorder %s1005_s14, %s1001_s13  ;;  %p47_p4 = scmp.eq.s32.totalorder %s1017_s17, 0 }
  0x2e   : > { %s1409_s28 = smov (%p34_p1, %s32_s28), 0  ;;  %p1396_p8 = scmp.ne.s32.totalorder %s1390_s21, 0 }
  0x2f   : > { %p1138_p6 = por %p47_p4, %p46_p2  ;;  %s36_s30 = ssub.s32 %s1013_s16, %s1409_s28 }
  0x30   : > { %p1144_p11 = por %p1396_p8, %p46_p2  ;;  %p817_p12 = scmp.lt.s32.totalorder %s1017_s17, 4 }
  0x31   : > { %p37_p10 = scmp.eq.s32.totalorder %s36_s30, 0  ;;  %s180_s26 = sand.u32 1, %s1005_s14  }
  0x32   : > { %s682_s4 = sshll.u32 %s180_s26, 8  ;;  %s697_s6 = sshll.u32 %s1013_s16, 12 }
  0x33   : > { %s1153_s5 = scalar_select %p37_p10, %s1005_s14, %s39_s25  }
  0x34   : > { %s1159_s9 = scalar_lea.hbm %s1381_s0, %s697_s6  ;;  %s184_s21 = scalar_lea.vmem [#allocation2], %s682_s4 }
  0x35   : > { %s192_s18 = sshll.u32 %s184_s21, 4  ;;  %p1165_p13 = pnand %p817_p12, %p1138_p6  ;;  %s1161_s18 = int_to_ptr.vmem [resolvable:$true] %s192_s18 }
  0x36   : > { %s1169_s25 = scalar_lea.sflag [#allocation3], %s180_s26  ;;  %s901_s30 = scalar_lea.hbm %s1159_s9, 4096 }
  0x37   : > { %p902_p0 = scmp.ne.s32.totalorder %s1159_s9, %s901_s30  ;;  %p903_p3 = pneg %p1165_p13 }
  0x38   : > { %s906_s29 = scalar_lea.hbm %s1381_s0, 16384  ;;  %p907_p9 = scmp.lt.u32.totalorder %s1159_s9, %s1381_s0 }
  0x39   : > { %p904_p5 = pnand %p903_p3, %p902_p0  ;;  %p908_p1 = scmp.lt.u32.totalorder %s906_s29, %s901_s30 }
  0x3a   : > { %p910_p4 = scmp.lt.u32.totalorder %s901_s30, %s1159_s9 }
  0x3b   : > { %p905_p7 = pneg %p904_p5  ;;  %p909_p2 = por %p908_p1, %p907_p9 }
  0x3d   : > { %p911_p6 = por %p910_p4, %p909_p2 }
  0x3f   : > { %p912_p8 = pnand %p911_p6, %p905_p7 }
  0x41   : > { %915 = shalt.err (!%p912_p8)
}
  0x42   : > { %s916_s26 = scalar_lea.vmem %s1161_s18, 4096  ;;  %s1022_s21 = smov [#allocation2]  }
  0x43   : > { %p917_p12 = scmp.ne.s32.totalorder %s1161_s18, %s916_s26  ;;  %s921_s4 = sshll.u32 %s1022_s21, 4  ;;  %s922_s4 = int_to_ptr.vmem [resolvable:$false] %s921_s4 }
  0x44   : > { %s923_s6 = scalar_lea.vmem %s922_s4, 8192  ;;  %p924_p5 = scmp.lt.s32.totalorder %s1161_s18, %s922_s4 }
  0x45   : > { %p919_p10 = pnand %p917_p12, %p903_p3  ;;  %p925_p9 = scmp.lt.s32.totalorder %s923_s6, %s916_s26 }
  0x47   : > { %p920_p0 = pneg %p919_p10  ;;  %p926_p1 = por %p925_p9, %p924_p5 }
  0x49   : > { %p927_p2 = pnand %p926_p1, %p920_p0 }
  0x4b   : > { %930 = shalt.err (!%p927_p2)
}
  0x4c   : > { %811 = dma.hbm_to_vmem [thread:$0]  (!%p1165_p13), %s1159_s9, 4096, %s1161_s18, %s1169_s25, %s1020_s10, %s1020_s10, %s1021_s11  }
  0x4d   : > { %p1399_p3 = scmp.ne.s32.totalorder %s1393_s24, 0 }
  0x4e   : > { %s1203_s30 = sand.u32 (!%p1399_p3), 1, %s1001_s13   ;;  %p1400_p7 = scmp.ne.s32.totalorder (!%p1399_p3), %s1391_s22, 0 }
  0x4f   : > { %204 = sbr.rel (%p1399_p3) target bundleno = 415 (0x19f), region = 32  ;;  %s687_s29 = sshll.u32 (!%p1399_p3), %s1203_s30, 8 }
  0x50   : > { %s207_s7 = scalar_lea.sflag (!%p1399_p3), [#allocation3], %s1203_s30  ;;  %s1209_s19 = scalar_lea.vmem (!%p1399_p3), [#allocation2], %s687_s29 }
  0x56   : > { %984 = dma.done.wait (%p1400_p7), %s207_s7, 4096  }
  0x57   : > { %986 = vsyncadd (%p1400_p7), %s207_s7, 4294963200  ;;  %p1401_p13 = scmp.ne.s32.totalorder %s1389_s20, 0 }
  0x59   : > { %988 = dma.done.wait (%p1401_p13), [#allocation6], 8192  }
  0x5a   : > { %990 = vsyncadd (%p1401_p13), [#allocation6], 4294959104  ;;  %v283_v0 = vld [vmem:[#allocation5 + $0x8] sm:$0xff]  ;;  %v285_v1 = vld [vmem:[#allocation5 + $0x18] sm:$0xff]  ;;  %s1264_s24 = scalar_lea.vmem [#allocation7], %s687_s29  ;;  %s699_s10 = sshll.u32 %s1009_s15, 12 }
  0x5b   : > { %v282_v2 = vld [vmem:[#allocation5] sm:$0xff]  ;;  %v700_v3 = vpack.c.bf16 %v285_v1, %v283_v0  ;;  %v284_v4 = vld [vmem:[#allocation5 + $0x10] sm:$0xff]  ;;  %v287_v5 = vld [vmem:[#allocation5 + $0x28] sm:$0xff]  ;;  %s568_s11 = sshll.u32 %s1264_s24, 4  ;;  %s1325_s18 = scalar_lea.hbm %s1384_s3, %s699_s10  ;;  %s1327_s11 = int_to_ptr.vmem [resolvable:$true] %s568_s11 }
  0x5c   : > { %v289_v6 = vld [vmem:[#allocation5 + $0x38] sm:$0xff]  ;;  %v702_v7 = vpack.c.bf16 %v284_v4, %v282_v2  ;;  %v286_v9 = vld [vmem:[#allocation5 + $0x20] sm:$0xff]  ;;  %v288_v10 = vld [vmem:[#allocation5 + $0x30] sm:$0xff]  ;;  %s552_s25 = scalar_lea.sflag [#allocation4], %s1203_s30  ;;  %s931_s8 = scalar_lea.vmem %s1327_s11, 4096 }
  0x5d   : > { %v704_v8 = vpack.c.bf16 %v289_v6, %v287_v5  ;;  %v291_v11 = vld [vmem:[#allocation5 + $0x48] sm:$0xff]  ;;  %701 = vmatprep.subr.bf16.mxu0 %v700_v3  ;;  %764 = vmatprep.subr.bf16.mxu1 %v700_v3  ;;  %v293_v12 = vld [vmem:[#allocation5 + $0x58] sm:$0xff]  ;;  %v706_v13 = vpack.c.bf16 %v288_v10, %v286_v9  ;;  %v290_v15 = vld [vmem:[#allocation5 + $0x40] sm:$0xff]  ;;  %p932_p4 = scmp.ne.s32.totalorder %s1327_s11, %s931_s8  ;;  %s1023_s26 = smov [#allocation7]  }
  0x5e   : > { %703 = vmatpush1.bf16.msra.mxu0 %v702_v7  ;;  %780 = vmatpush1.bf16.msra.mxu1 %v702_v7  ;;  %v708_v14 = vpack.c.bf16 %v293_v12, %v291_v11  ;;  %v292_v16 = vld [vmem:[#allocation5 + $0x50] sm:$0xff]  ;;  %v295_v17 = vld [vmem:[#allocation5 + $0x68] sm:$0xff]  ;;  %v297_v18 = vld [vmem:[#allocation5 + $0x78] sm:$0xff]  ;;  %s935_s21 = sshll.u32 %s1023_s26, 4  ;;  %s936_s21 = int_to_ptr.vmem [resolvable:$false] %s935_s21 }
  0x5f   : > { %705 = vmatprep.subr.bf16.mxu0 %v704_v8  ;;  %765 = vmatprep.subr.bf16.mxu1 %v704_v8  ;;  %v710_v19 = vpack.c.bf16 %v292_v16, %v290_v15  ;;  %v712_v20 = vpack.c.bf16 %v297_v18, %v295_v17  ;;  %v294_v21 = vld [vmem:[#allocation5 + $0x60] sm:$0xff]  ;;  %v296_v22 = vld [vmem:[#allocation5 + $0x70] sm:$0xff]  ;;  %v299_v23 = vld [vmem:[#allocation5 + $0x88] sm:$0xff]  ;;  %p933_p6 = pnand %p932_p4, %p1144_p11  ;;  %s937_s4 = scalar_lea.vmem %s936_s21, 8192 }
  0x60   : > { %v301_v24 = vld [vmem:[#allocation5 + $0x98] sm:$0xff]  ;;  %v714_v25 = vpack.c.bf16 %v296_v22, %v294_v21  ;;  %v298_v27 = vld [vmem:[#allocation5 + $0x80] sm:$0xff]  ;;  %v300_v28 = vld [vmem:[#allocation5 + $0x90] sm:$0xff]  ;;  %p938_p12 = scmp.lt.s32.totalorder %s1327_s11, %s936_s21  ;;  %p939_p10 = scmp.lt.s32.totalorder %s937_s4, %s931_s8 }
  0x61   : > { %v716_v26 = vpack.c.bf16 %v301_v24, %v299_v23  ;;  %v303_v29 = vld [vmem:[#allocation5 + $0xa8] sm:$0xff]  ;;  %v305_v30 = vld [vmem:[#allocation5 + $0xb8] sm:$0xff]  ;;  %v718_v31 = vpack.c.bf16 %v300_v28, %v298_v27  ;;  %v302_v33 = vld [vmem:[#allocation5 + $0xa0] sm:$0xff]  ;;  %p934_p8 = pneg %p933_p6 }
  0x62   : > { %707 = vmatpush1.bf16.msra.mxu0 %v706_v13  ;;  %781 = vmatpush1.bf16.msra.mxu1 %v706_v13  ;;  %v720_v32 = vpack.c.bf16 %v305_v30, %v303_v29  ;;  %v304_v34 = vld [vmem:[#allocation5 + $0xb0] sm:$0xff]  ;;  %v307_v35 = vld [vmem:[#allocation5 + $0xc8] sm:$0xff]  ;;  %v309_v36 = vld [vmem:[#allocation5 + $0xd8] sm:$0xff]  ;;  %p940_p0 = por %p939_p10, %p938_p12 }
  0x63   : > { %709 = vmatprep.subr.bf16.mxu0 %v708_v14  ;;  %766 = vmatprep.subr.bf16.mxu1 %v708_v14  ;;  %v722_v37 = vpack.c.bf16 %v304_v34, %v302_v33  ;;  %v306_v38 = vld [vmem:[#allocation5 + $0xc0] sm:$0xff]  ;;  %v724_v39 = vpack.c.bf16 %v309_v36, %v307_v35  ;;  %v308_v40 = vld [vmem:[#allocation5 + $0xd0] sm:$0xff]  ;;  %v251_v41 = vld [vmem:[%s1209_s19 + $0x8] sm:$0xff] }
  0x64   : > { %v267_v42 = vld [vmem:[%s1209_s19 + $0x88] sm:$0xff]  ;;  %v313_v44 = vld [vmem:[#allocation5 + $0xf8] sm:$0xff]  ;;  %422 = vmatprep.mubr.f32.mxu0 %v251_v41  ;;  %v726_v45 = vpack.c.bf16 %v308_v40, %v306_v38  ;;  %v310_v47 = vld [vmem:[#allocation5 + $0xe0] sm:$0xff]  ;;  %p941_p5 = pnand %p940_p0, %p934_p8 }
  0x65   : > { %v311_v43 = vld [vmem:[#allocation5 + $0xe8] sm:$0xff]  ;;  %470 = vmatprep.mubr.f32.mxu1 %v267_v42  ;;  %v312_v48 = vld [vmem:[#allocation5 + $0xf0] sm:$0xff]  ;;  %v317_v50 = vld [vmem:[#allocation5 + $0x118] sm:$0xff] }
  0x66   : > { %711 = vmatpush1.bf16.msra.mxu0 %v710_v19  ;;  %782 = vmatpush1.bf16.msra.mxu1 %v710_v19  ;;  %v728_v46 = vpack.c.bf16 %v313_v44, %v311_v43  ;;  %v315_v49 = vld [vmem:[#allocation5 + $0x108] sm:$0xff]  ;;  %v730_v51 = vpack.c.bf16 %v312_v48, %v310_v47  ;;  %v314_v53 = vld [vmem:[#allocation5 + $0x100] sm:$0xff]  ;;  %v316_v54 = vld [vmem:[#allocation5 + $0x110] sm:$0xff] }
  0x67   : > { %713 = vmatprep.subr.bf16.mxu0 %v712_v20  ;;  %767 = vmatprep.subr.bf16.mxu1 %v712_v20  ;;  %v732_v52 = vpack.c.bf16 %v317_v50, %v315_v49  ;;  %v319_v55 = vld [vmem:[#allocation5 + $0x128] sm:$0xff]  ;;  %v321_v56 = vld [vmem:[#allocation5 + $0x138] sm:$0xff]  ;;  %v734_v57 = vpack.c.bf16 %v316_v54, %v314_v53  ;;  %v318_v59 = vld [vmem:[#allocation5 + $0x120] sm:$0xff] }
  0x68   : > { %v736_v58 = vpack.c.bf16 %v321_v56, %v319_v55  ;;  %v320_v60 = vld [vmem:[#allocation5 + $0x130] sm:$0xff]  ;;  %v323_v61 = vld [vmem:[#allocation5 + $0x148] sm:$0xff]  ;;  %v325_v62 = vld [vmem:[#allocation5 + $0x158] sm:$0xff] }
  0x69   : > { %v738_v63 = vpack.c.bf16 %v320_v60, %v318_v59  ;;  %v740_v0 = vpack.c.bf16 %v325_v62, %v323_v61  ;;  %v322_v1 = vld [vmem:[#allocation5 + $0x140] sm:$0xff]  ;;  %v324_v2 = vld [vmem:[#allocation5 + $0x150] sm:$0xff]  ;;  %v327_v3 = vld [vmem:[#allocation5 + $0x168] sm:$0xff] }
  0x6a   : > { %715 = vmatpush1.bf16.msra.mxu0 %v714_v25  ;;  %783 = vmatpush1.bf16.msra.mxu1 %v714_v25  ;;  %v329_v4 = vld [vmem:[#allocation5 + $0x178] sm:$0xff]  ;;  %v742_v5 = vpack.c.bf16 %v324_v2, %v322_v1  ;;  %v326_v7 = vld [vmem:[#allocation5 + $0x160] sm:$0xff]  ;;  %v328_v8 = vld [vmem:[#allocation5 + $0x170] sm:$0xff] }
  0x6b   : > { %717 = vmatprep.subr.bf16.mxu0 %v716_v26  ;;  %768 = vmatprep.subr.bf16.mxu1 %v716_v26  ;;  %v744_v6 = vpack.c.bf16 %v329_v4, %v327_v3  ;;  %v331_v9 = vld [vmem:[#allocation5 + $0x188] sm:$0xff]  ;;  %v333_v10 = vld [vmem:[#allocation5 + $0x198] sm:$0xff]  ;;  %v746_v11 = vpack.c.bf16 %v328_v8, %v326_v7  ;;  %v330_v13 = vld [vmem:[#allocation5 + $0x180] sm:$0xff] }
  0x6c   : > { %v748_v12 = vpack.c.bf16 %v333_v10, %v331_v9  ;;  %v332_v14 = vld [vmem:[#allocation5 + $0x190] sm:$0xff]  ;;  %v335_v15 = vld [vmem:[#allocation5 + $0x1a8] sm:$0xff]  ;;  %v337_v16 = vld [vmem:[#allocation5 + $0x1b8] sm:$0xff] }
  0x6d   : > { %v750_v17 = vpack.c.bf16 %v332_v14, %v330_v13  ;;  %v752_v18 = vpack.c.bf16 %v337_v16, %v335_v15  ;;  %v334_v19 = vld [vmem:[#allocation5 + $0x1a0] sm:$0xff]  ;;  %v336_v20 = vld [vmem:[#allocation5 + $0x1b0] sm:$0xff]  ;;  %v339_v21 = vld [vmem:[#allocation5 + $0x1c8] sm:$0xff] }
  0x6e   : > { %719 = vmatpush1.bf16.msra.mxu0 %v718_v31  ;;  %784 = vmatpush1.bf16.msra.mxu1 %v718_v31  ;;  %v341_v22 = vld [vmem:[#allocation5 + $0x1d8] sm:$0xff]  ;;  %v754_v23 = vpack.c.bf16 %v336_v20, %v334_v19  ;;  %v338_v25 = vld [vmem:[#allocation5 + $0x1c0] sm:$0xff]  ;;  %v340_v26 = vld [vmem:[#allocation5 + $0x1d0] sm:$0xff] }
  0x6f   : > { %721 = vmatprep.subr.bf16.mxu0 %v720_v32  ;;  %769 = vmatprep.subr.bf16.mxu1 %v720_v32  ;;  %v756_v24 = vpack.c.bf16 %v341_v22, %v339_v21  ;;  %v343_v27 = vld [vmem:[#allocation5 + $0x1e8] sm:$0xff]  ;;  %v345_v28 = vld [vmem:[#allocation5 + $0x1f8] sm:$0xff]  ;;  %v758_v29 = vpack.c.bf16 %v340_v26, %v338_v25  ;;  %v342_v31 = vld [vmem:[#allocation5 + $0x1e0] sm:$0xff] }
  0x70   : > { %v760_v30 = vpack.c.bf16 %v345_v28, %v343_v27  ;;  %v344_v32 = vld [vmem:[#allocation5 + $0x1f0] sm:$0xff]  ;;  %v250_v34 = vld [vmem:[%s1209_s19] sm:$0xff]  ;;  %v253_v36 = vld [vmem:[%s1209_s19 + $0x18] sm:$0xff] }
  0x71   : > { %v762_v33 = vpack.c.bf16 %v344_v32, %v342_v31  ;;  %v266_v35 = vld [vmem:[%s1209_s19 + $0x80] sm:$0xff]  ;;  %v252_v38 = vld [vmem:[%s1209_s19 + $0x10] sm:$0xff]  ;;  %v255_v40 = vld [vmem:[%s1209_s19 + $0x28] sm:$0xff] }
  0x72   : > { %723 = vmatpush1.bf16.msra.mxu0 %v722_v37  ;;  %785 = vmatpush1.bf16.msra.mxu1 %v722_v37  ;;  %v269_v37 = vld [vmem:[%s1209_s19 + $0x98] sm:$0xff]  ;;  %v271_v41 = vld [vmem:[%s1209_s19 + $0xa8] sm:$0xff]  ;;  %v254_v42 = vld [vmem:[%s1209_s19 + $0x20] sm:$0xff] }
  0x73   : > { %725 = vmatprep.subr.bf16.mxu0 %v724_v39  ;;  %770 = vmatprep.subr.bf16.mxu1 %v724_v39  ;;  %v268_v39 = vld [vmem:[%s1209_s19 + $0x90] sm:$0xff]  ;;  %v270_v43 = vld [vmem:[%s1209_s19 + $0xa0] sm:$0xff]  ;;  %v257_v44 = vld [vmem:[%s1209_s19 + $0x38] sm:$0xff] }
  0x74   : > { %v272_v47 = vld [vmem:[%s1209_s19 + $0xb0] sm:$0xff]  ;;  %v259_v48 = vld [vmem:[%s1209_s19 + $0x48] sm:$0xff]  ;;  %v258_v50 = vld [vmem:[%s1209_s19 + $0x40] sm:$0xff] }
  0x75   : > { %v275_v49 = vld [vmem:[%s1209_s19 + $0xc8] sm:$0xff]  ;;  %v277_v53 = vld [vmem:[%s1209_s19 + $0xd8] sm:$0xff]  ;;  %v260_v54 = vld [vmem:[%s1209_s19 + $0x50] sm:$0xff] }
  0x76   : > { %727 = vmatpush1.bf16.msra.mxu0 %v726_v45  ;;  %786 = vmatpush1.bf16.msra.mxu1 %v726_v45  ;;  %v273_v45 = vld [vmem:[%s1209_s19 + $0xb8] sm:$0xff]  ;;  %v276_v55 = vld [vmem:[%s1209_s19 + $0xd0] sm:$0xff]  ;;  %v263_v56 = vld [vmem:[%s1209_s19 + $0x68] sm:$0xff] }
  0x77   : > { %729 = vmatprep.subr.bf16.mxu0 %v728_v46  ;;  %771 = vmatprep.subr.bf16.mxu1 %v728_v46  ;;  %v256_v46 = vld [vmem:[%s1209_s19 + $0x30] sm:$0xff]  ;;  %v278_v59 = vld [vmem:[%s1209_s19 + $0xe0] sm:$0xff]  ;;  %v265_v60 = vld [vmem:[%s1209_s19 + $0x78] sm:$0xff] }
  0x78   : > { %v281_v61 = vld [vmem:[%s1209_s19 + $0xf8] sm:$0xff]  ;;  %v264_v62 = vld [vmem:[%s1209_s19 + $0x70] sm:$0xff]  ;;  %v346_v3 = vld [vmem:[%s1383_s2] sm:$0x3] }
  0x7a   : > { %731 = vmatpush1.bf16.msra.mxu0 %v730_v51  ;;  %787 = vmatpush1.bf16.msra.mxu1 %v730_v51  ;;  %v274_v51 = vld [vmem:[%s1209_s19 + $0xc0] sm:$0xff] }
  0x7b   : > { %733 = vmatprep.subr.bf16.mxu0 %v732_v52  ;;  %772 = vmatprep.subr.bf16.mxu1 %v732_v52  ;;  %v261_v52 = vld [vmem:[%s1209_s19 + $0x58] sm:$0xff] }
  0x7e   : > { %735 = vmatpush1.bf16.msra.mxu0 %v734_v57  ;;  %788 = vmatpush1.bf16.msra.mxu1 %v734_v57  ;;  %v279_v57 = vld [vmem:[%s1209_s19 + $0xe8] sm:$0xff] }
  0x7f   : > { %737 = vmatprep.subr.bf16.mxu0 %v736_v58  ;;  %773 = vmatprep.subr.bf16.mxu1 %v736_v58  ;;  %v262_v58 = vld [vmem:[%s1209_s19 + $0x60] sm:$0xff] }
  0x82   : > { %739 = vmatpush1.bf16.msra.mxu0 %v738_v63  ;;  %789 = vmatpush1.bf16.msra.mxu1 %v738_v63  ;;  %v280_v63 = vld [vmem:[%s1209_s19 + $0xf0] sm:$0xff] }
  0x83   : > { %741 = vmatprep.subr.bf16.mxu0 %v740_v0  ;;  %774 = vmatprep.subr.bf16.mxu1 %v740_v0  ;;  %v348_v0 = vlaneseq }
  0x85   : > { %v349_v1 = vshrl.u32 %v348_v0, 7 }
  0x86   : > { %743 = vmatpush1.bf16.msra.mxu0 %v742_v5  ;;  %790 = vmatpush1.bf16.msra.mxu1 %v742_v5 }
  0x87   : > { %745 = vmatprep.subr.bf16.mxu0 %v744_v6  ;;  %775 = vmatprep.subr.bf16.mxu1 %v744_v6  ;;  %v350_v2 = vsub.s32 0, %v349_v1  ;;  %v354_v4 = vsub.s32 1, %v349_v1 }
  0x89   : > { %v1254_v5 = vrot.slane %v346_v3, %v350_v2  ;;  %v1256_v6 = vrot.slane %v346_v3, %v354_v4 }
  0x8a   : > { %747 = vmatpush1.bf16.msra.mxu0 %v746_v11  ;;  %791 = vmatpush1.bf16.msra.mxu1 %v746_v11 }
  0x8b   : > { %749 = vmatprep.subr.bf16.mxu0 %v748_v12  ;;  %776 = vmatprep.subr.bf16.mxu1 %v748_v12 }
  0x8e   : > { %751 = vmatpush1.bf16.msra.mxu0 %v750_v17  ;;  %792 = vmatpush1.bf16.msra.mxu1 %v750_v17 }
  0x8f   : > { %753 = vmatprep.subr.bf16.mxu0 %v752_v18  ;;  %777 = vmatprep.subr.bf16.mxu1 %v752_v18 }
  0x92   : > { %755 = vmatpush1.bf16.msra.mxu0 %v754_v23  ;;  %793 = vmatpush1.bf16.msra.mxu1 %v754_v23 }
  0x93   : > { %757 = vmatprep.subr.bf16.mxu0 %v756_v24  ;;  %778 = vmatprep.subr.bf16.mxu1 %v756_v24 }
  0x96   : > { %759 = vmatpush1.bf16.msra.mxu0 %v758_v29  ;;  %794 = vmatpush1.bf16.msra.mxu1 %v758_v29 }
  0x97   : > { %761 = vmatprep.subr.bf16.mxu0 %v760_v30  ;;  %779 = vmatprep.subr.bf16.mxu1 %v760_v30 }
  0x9a   : > { %763 = vmatpush1.bf16.msra.mxu0 %v762_v33  ;;  %795 = vmatpush1.bf16.msra.mxu1 %v762_v33 }
  0x9d   : > { %423 = vmatmul.mubr.f32.vlgmr.msra.gmra.mrb[0].mxu0 %v250_v34  ;;  %471 = vmatmul.mubr.f32.vlgmr.msra.gmra.mrb[0].mxu1 %v266_v35 }
  0x9e   : > { %428 = vmatprep.mubr.f32.mxu0 %v253_v36  ;;  %476 = vmatprep.mubr.f32.mxu1 %v269_v37 }
  0xa1   : > { %429 = vmatmul.mubr.f32.gmra.mrb[2].mxu0 %v252_v38  ;;  %477 = vmatmul.mubr.f32.gmra.mrb[2].mxu1 %v268_v39 }
  0xa2   : > { %434 = vmatprep.mubr.f32.mxu0 %v255_v40  ;;  %482 = vmatprep.mubr.f32.mxu1 %v271_v41 }
  0xa5   : > { %435 = vmatmul.mubr.f32.gmra.mrb[4].mxu0 %v254_v42  ;;  %483 = vmatmul.mubr.f32.gmra.mrb[4].mxu1 %v270_v43 }
  0xa6   : > { %440 = vmatprep.mubr.f32.mxu0 %v257_v44  ;;  %488 = vmatprep.mubr.f32.mxu1 %v273_v45 }
  0xa9   : > { %441 = vmatmul.mubr.f32.gmra.mrb[6].mxu0 %v256_v46  ;;  %489 = vmatmul.mubr.f32.gmra.mrb[6].mxu1 %v272_v47 }
  0xaa   : > { %446 = vmatprep.mubr.f32.mxu0 %v259_v48  ;;  %494 = vmatprep.mubr.f32.mxu1 %v275_v49 }
  0xad   : > { %447 = vmatmul.mubr.f32.gmra.mrb[8].mxu0 %v258_v50  ;;  %495 = vmatmul.mubr.f32.gmra.mrb[8].mxu1 %v274_v51 }
  0xae   : > { %452 = vmatprep.mubr.f32.mxu0 %v261_v52  ;;  %500 = vmatprep.mubr.f32.mxu1 %v277_v53 }
  0xb1   : > { %453 = vmatmul.mubr.f32.gmra.mrb[10].mxu0 %v260_v54  ;;  %501 = vmatmul.mubr.f32.gmra.mrb[10].mxu1 %v276_v55 }
  0xb2   : > { %458 = vmatprep.mubr.f32.mxu0 %v263_v56  ;;  %506 = vmatprep.mubr.f32.mxu1 %v279_v57 }
  0xb5   : > { %459 = vmatmul.mubr.f32.gmra.mrb[12].mxu0 %v262_v58  ;;  %507 = vmatmul.mubr.f32.gmra.mrb[12].mxu1 %v278_v59 }
  0xb6   : > { %464 = vmatprep.mubr.f32.mxu0 %v265_v60  ;;  %512 = vmatprep.mubr.f32.mxu1 %v281_v61 }
  0xb9   : > { %465 = vmatmul.mubr.f32.gmra.mrb[14].mxu0 %v264_v62  ;;  %513 = vmatmul.mubr.f32.gmra.mrb[14].mxu1 %v280_v63 }
 0x170   : > { %v424_v7 = vpop.f32.mrb[0].mxu0  ;;  %v472_v8 = vpop.f32.mrb[0].mxu1 }
 0x171   : > { %v425_v9 = vadd.f32 %v424_v7, %v1254_v5  ;;  %v473_v10 = vadd.f32 %v472_v8, %v1254_v5  ;;  %v426_v11 = vpop.f32.mrb[1].mxu0  ;;  %v474_v12 = vpop.f32.mrb[1].mxu1 }
 0x172   : > { %v427_v13 = vadd.f32 %v426_v11, %v1256_v6  ;;  %v475_v14 = vadd.f32 %v474_v12, %v1256_v6 }
 0x173   : > { %519 = vst [vmem:[%s1264_s24] sm:$0xff] %v425_v9  ;;  %535 = vst [vmem:[%s1264_s24 + $0x80] sm:$0xff] %v473_v10 }
 0x174   : > { %520 = vst [vmem:[%s1264_s24 + $0x8] sm:$0xff] %v427_v13  ;;  %536 = vst [vmem:[%s1264_s24 + $0x88] sm:$0xff] %v475_v14  ;;  %v430_v15 = vpop.f32.mrb[2].mxu0  ;;  %v478_v16 = vpop.f32.mrb[2].mxu1 }
 0x175   : > { %v431_v17 = vadd.f32 %v430_v15, %v1254_v5  ;;  %v479_v18 = vadd.f32 %v478_v16, %v1254_v5  ;;  %v432_v19 = vpop.f32.mrb[3].mxu0  ;;  %v480_v20 = vpop.f32.mrb[3].mxu1 }
 0x176   : > { %v433_v21 = vadd.f32 %v432_v19, %v1256_v6  ;;  %v481_v22 = vadd.f32 %v480_v20, %v1256_v6 }
 0x177   : > { %521 = vst [vmem:[%s1264_s24 + $0x10] sm:$0xff] %v431_v17  ;;  %537 = vst [vmem:[%s1264_s24 + $0x90] sm:$0xff] %v479_v18 }
 0x178   : > { %522 = vst [vmem:[%s1264_s24 + $0x18] sm:$0xff] %v433_v21  ;;  %538 = vst [vmem:[%s1264_s24 + $0x98] sm:$0xff] %v481_v22  ;;  %v436_v23 = vpop.f32.mrb[4].mxu0  ;;  %v484_v24 = vpop.f32.mrb[4].mxu1 }
 0x179   : > { %v437_v25 = vadd.f32 %v436_v23, %v1254_v5  ;;  %v485_v26 = vadd.f32 %v484_v24, %v1254_v5  ;;  %v438_v27 = vpop.f32.mrb[5].mxu0  ;;  %v486_v28 = vpop.f32.mrb[5].mxu1 }
 0x17a   : > { %v439_v29 = vadd.f32 %v438_v27, %v1256_v6  ;;  %v487_v30 = vadd.f32 %v486_v28, %v1256_v6 }
 0x17b   : > { %523 = vst [vmem:[%s1264_s24 + $0x20] sm:$0xff] %v437_v25  ;;  %539 = vst [vmem:[%s1264_s24 + $0xa0] sm:$0xff] %v485_v26 }
 0x17c   : > { %524 = vst [vmem:[%s1264_s24 + $0x28] sm:$0xff] %v439_v29  ;;  %540 = vst [vmem:[%s1264_s24 + $0xa8] sm:$0xff] %v487_v30  ;;  %v442_v31 = vpop.f32.mrb[6].mxu0  ;;  %v490_v32 = vpop.f32.mrb[6].mxu1 }
 0x17d   : > { %v443_v33 = vadd.f32 %v442_v31, %v1254_v5  ;;  %v491_v34 = vadd.f32 %v490_v32, %v1254_v5  ;;  %v444_v35 = vpop.f32.mrb[7].mxu0  ;;  %v492_v36 = vpop.f32.mrb[7].mxu1 }
 0x17e   : > { %v445_v37 = vadd.f32 %v444_v35, %v1256_v6  ;;  %v493_v38 = vadd.f32 %v492_v36, %v1256_v6 }
 0x17f   : > { %525 = vst [vmem:[%s1264_s24 + $0x30] sm:$0xff] %v443_v33  ;;  %541 = vst [vmem:[%s1264_s24 + $0xb0] sm:$0xff] %v491_v34 }
 0x180   : > { %526 = vst [vmem:[%s1264_s24 + $0x38] sm:$0xff] %v445_v37  ;;  %542 = vst [vmem:[%s1264_s24 + $0xb8] sm:$0xff] %v493_v38  ;;  %v448_v39 = vpop.f32.mrb[8].mxu0  ;;  %v496_v40 = vpop.f32.mrb[8].mxu1 }
 0x181   : > { %v449_v41 = vadd.f32 %v448_v39, %v1254_v5  ;;  %v497_v42 = vadd.f32 %v496_v40, %v1254_v5  ;;  %v450_v43 = vpop.f32.mrb[9].mxu0  ;;  %v498_v44 = vpop.f32.mrb[9].mxu1 }
 0x182   : > { %v451_v45 = vadd.f32 %v450_v43, %v1256_v6  ;;  %v499_v46 = vadd.f32 %v498_v44, %v1256_v6 }
 0x183   : > { %527 = vst [vmem:[%s1264_s24 + $0x40] sm:$0xff] %v449_v41  ;;  %543 = vst [vmem:[%s1264_s24 + $0xc0] sm:$0xff] %v497_v42 }
 0x184   : > { %528 = vst [vmem:[%s1264_s24 + $0x48] sm:$0xff] %v451_v45  ;;  %544 = vst [vmem:[%s1264_s24 + $0xc8] sm:$0xff] %v499_v46  ;;  %v454_v47 = vpop.f32.mrb[10].mxu0  ;;  %v502_v48 = vpop.f32.mrb[10].mxu1 }
 0x185   : > { %v455_v49 = vadd.f32 %v454_v47, %v1254_v5  ;;  %v503_v50 = vadd.f32 %v502_v48, %v1254_v5  ;;  %v456_v51 = vpop.f32.mrb[11].mxu0  ;;  %v504_v52 = vpop.f32.mrb[11].mxu1 }
 0x186   : > { %v457_v53 = vadd.f32 %v456_v51, %v1256_v6  ;;  %v505_v54 = vadd.f32 %v504_v52, %v1256_v6 }
 0x187   : > { %529 = vst [vmem:[%s1264_s24 + $0x50] sm:$0xff] %v455_v49  ;;  %545 = vst [vmem:[%s1264_s24 + $0xd0] sm:$0xff] %v503_v50 }
 0x188   : > { %530 = vst [vmem:[%s1264_s24 + $0x58] sm:$0xff] %v457_v53  ;;  %546 = vst [vmem:[%s1264_s24 + $0xd8] sm:$0xff] %v505_v54  ;;  %v460_v55 = vpop.f32.mrb[12].mxu0  ;;  %v508_v56 = vpop.f32.mrb[12].mxu1 }
 0x189   : > { %v461_v57 = vadd.f32 %v460_v55, %v1254_v5  ;;  %v509_v58 = vadd.f32 %v508_v56, %v1254_v5  ;;  %v462_v59 = vpop.f32.mrb[13].mxu0  ;;  %v510_v60 = vpop.f32.mrb[13].mxu1 }
 0x18a   : > { %v463_v61 = vadd.f32 %v462_v59, %v1256_v6  ;;  %v511_v62 = vadd.f32 %v510_v60, %v1256_v6 }
 0x18b   : > { %531 = vst [vmem:[%s1264_s24 + $0x60] sm:$0xff] %v461_v57  ;;  %547 = vst [vmem:[%s1264_s24 + $0xe0] sm:$0xff] %v509_v58 }
 0x18c   : > { %532 = vst [vmem:[%s1264_s24 + $0x68] sm:$0xff] %v463_v61  ;;  %548 = vst [vmem:[%s1264_s24 + $0xe8] sm:$0xff] %v511_v62  ;;  %v466_v63 = vpop.f32.mrb[14].mxu0  ;;  %v514_v0 = vpop.f32.mrb[14].mxu1 }
 0x18d   : > { %v467_v1 = vadd.f32 %v466_v63, %v1254_v5  ;;  %v515_v2 = vadd.f32 %v514_v0, %v1254_v5  ;;  %v468_v3 = vpop.f32.mrb[15].mxu0  ;;  %v516_v4 = vpop.f32.mrb[15].mxu1 }
 0x18e   : > { %v469_v7 = vadd.f32 %v468_v3, %v1256_v6  ;;  %v517_v8 = vadd.f32 %v516_v4, %v1256_v6 }
 0x18f   : > { %533 = vst [vmem:[%s1264_s24 + $0x70] sm:$0xff] %v467_v1  ;;  %549 = vst [vmem:[%s1264_s24 + $0xf0] sm:$0xff] %v515_v2 }
 0x190   : > { %534 = vst [vmem:[%s1264_s24 + $0x78] sm:$0xff] %v469_v7  ;;  %550 = vst [vmem:[%s1264_s24 + $0xf8] sm:$0xff] %v517_v8 }
 0x191   : > { %944 = shalt.err (!%p941_p5)
}
 0x192   : > { %s945_s6 = scalar_lea.hbm %s1325_s18, 4096  ;;  %s949_s19 = scalar_lea.hbm %s1384_s3, 16384 }
 0x193   : > { %p946_p9 = scmp.ne.s32.totalorder %s1325_s18, %s945_s6  ;;  %p950_p3 = scmp.lt.u32.totalorder %s1325_s18, %s1384_s3 }
 0x194   : > { %p951_p7 = scmp.lt.u32.totalorder %s949_s19, %s945_s6  ;;  %p953_p4 = scmp.lt.u32.totalorder %s945_s6, %s1325_s18 }
 0x195   : > { %p947_p1 = pnand %p946_p9, %p1144_p11 }
 0x196   : > { %p952_p13 = por %p951_p7, %p950_p3 }
 0x197   : > { %p948_p2 = pneg %p947_p1 }
 0x198   : > { %p954_p6 = por %p953_p4, %p952_p13 }
 0x19a   : > { %p955_p8 = pnand %p954_p6, %p948_p2 }
 0x19c   : > { %958 = shalt.err (!%p955_p8)
}
 0x19d   : > { %s1024_s24 = smov 256   ;;  %s1025_s10 = smov 16  }
 0x19e   : > { %802 = dma.vmem_to_hbm [thread:$0]  (%p1144_p11), %s1327_s11, 4096, %s1325_s18, %s552_s25, %s1024_s24, %s1024_s24, %s1025_s10  }
 0x19f PF: > { %p819_p12 = scmp.ge.s32.totalorder %s1017_s17, 2  ;;  %s583_s15 = sand.u32 1, %s997_s12  }
 0x1a0   : > { %p1402_p10 = scmp.ne.s32.totalorder %s1392_s23, 0  ;;  %s584_s9 = scalar_lea.sflag [#allocation4], %s583_s15 }
 0x1a2   : > { %p813_p0 = pnand %p819_p12, %p1402_p10 }
 0x1a4   : > { %992 = dma.done.wait (!%p813_p0), %s584_s9, 4096  }
 0x1a5   : > { %994 = vsyncadd (!%p813_p0), %s584_s9, 4294963200  ;;  %s20_s17 = sadd.s32 1, %s1017_s17   ;;  %s1403_s12 = smov %s1001_s13 }
 0x1a6   : > { %p17_p5 = scmp.ge.s32.totalorder %s20_s17, 6   ;;  %s1404_s13 = smov %s1005_s14 }
 0x1a7   : > { %s1405_s14 = smov %s1153_s5  ;;  %s1406_s15 = smov %s1013_s16 }
 0x1a8   : > { %s1407_s16 = smov %s1409_s28  ;;  %19 = sbr.rel (!%p17_p5) target bundleno = 7 (0x7), region = 85 }
 0x1af   :  { %589 = vsyncpa [#allocation3], 1 }
 0x1b0   :  { %591 = vsyncpa [#allocation3 + $0x1], 1 }
 0x1b1   :  { %592 = vsyncpa [#allocation6], 1 }
 0x1b2   :  { %593 = vsyncpa [#allocation4], 1 }
 0x1b3   :  { %595 = vsyncpa [#allocation4 + $0x1], 1 }

// kernel: tpu_custom_call.1
= control target key start
LH: loop header
LB: loop body
LE: loop exit
PB: predicated region body
PF: predicated region fallthrough
CT: control target
= control target key end

     0   :  { %8 = vsyncpa [#allocation3], 0  ;;  %s1381_s0 = inlined_call_operand.hbm [shape: f32[512,256], index: 0, kind: input, shape index: {}]   ;;  %s1382_s1 = inlined_call_operand.hbm [shape: f32[256,256], index: 1, kind: input, shape index: {}]   ;;  %s1383_s2 = inlined_call_operand.vmem [shape: f32[1,256], index: 2, kind: input, shape index: {}]   ;;  %s1384_s3 = inlined_call_operand.hbm [shape: f32[512,256], index: 3, kind: output, shape index: {}]  }
   0x1   :  { %10 = vsyncpa [#allocation3 + $0x1], 0 }
   0x2   :  { %11 = vsyncpa [#allocation6], 0 }
   0x3   :  { %12 = vsyncpa [#allocation4], 0 }
   0x4   :  { %14 = vsyncpa [#allocation4 + $0x1], 0  ;;  %s1046_s12 = smov 0   ;;  %s1048_s13 = smov 0  }
   0x5   :  { %s1050_s14 = smov 0   ;;  %s1052_s15 = smov 0  }
   0x6   :  { %s1054_s16 = smov 0   ;;  %s1056_s17 = smov 0  }
   0x7 LB: > { %s676_s18 = sadd.s32 4294967295, %s1017_s17   ;;  %s677_s19 = sadd.s32 4294967294, %s1017_s17   ;;  %s1017_s17 = sphi %s1056_s17, %s20_s17   ;;  %s1013_s16 = sphi %s1054_s16, %s1407_s16   ;;  %s1009_s15 = sphi %s1052_s15, %s1406_s15   ;;  %s1005_s14 = sphi %s1050_s14, %s1405_s14   ;;  %s1001_s13 = sphi %s1048_s13, %s1404_s13   ;;  %s997_s12 = sphi %s1046_s12, %s1403_s12  }
   0x8   : > { %p52_p0 = scmp.ne.s32.totalorder %s1001_s13, %s997_s12  ;;  %p1080_p1 = scmp.eq.s32.totalorder %s676_s18, 0 }
   0x9   : > { %p1084_p2 = scmp.eq.s32.totalorder %s676_s18, 3  ;;  %p136_p3 = scmp.eq.s32.totalorder %s677_s19, 3 }
   0xa   : > { %s1389_s20 = scalar_select %p1080_p1, 1, 0 }
   0xb   : > { %s1390_s21 = scalar_select %p1084_p2, 1, 0 }
   0xc   : > { %p1090_p4 = por %p1080_p1, %p52_p0  ;;  %p678_p5 = scmp.ge.s32.totalorder %s1017_s17, 1 }
   0xd   : > { %p1095_p6 = por %p136_p3, %p52_p0  ;;  %p143_p7 = scmp.lt.s32.totalorder %s1017_s17, 5 }
   0xe   : > { %s1391_s22 = scalar_select %p1090_p4, 1, 0 }
   0xf   : > { %s1392_s23 = scalar_select %p1095_p6, 1, 0 }
  0x10   : > { %p1100_p8 = pnand %p678_p5, %p143_p7  ;;  %s1019_s25 = smov [#allocation5]  }
  0x11   : > { %s158_s26 = sshll.u32 %s1019_s25, 4  ;;  %s32_s28 = sadd.s32 1, %s1013_s16  ;;  %s159_s26 = int_to_ptr.vmem [resolvable:$true] %s158_s26 }
  0x12   : > { %s1393_s24 = scalar_select %p1100_p8, 1, 0 }
  0x13   : > { %p804_p9 = pneg %p1100_p8  ;;  %s873_s4 = scalar_lea.hbm %s1382_s1, 8192 }
  0x14   : > { %p874_p11 = scmp.ne.s32.totalorder %s1382_s1, %s873_s4  ;;  %p880_p3 = scmp.lt.u32.totalorder %s873_s4, %s1382_s1 }
  0x15   : > { %p1108_p10 = pnand %p804_p9, %p1080_p1 }
  0x17   : > { %p875_p12 = pneg %p1108_p10 }
  0x19   : > { %p876_p13 = pnand %p875_p12, %p874_p11 }
  0x1b   : > { %p877_p0 = pneg %p876_p13 }
  0x1d   : > { %p882_p5 = pnand %p880_p3, %p877_p0 }
  0x1f   : > { %885 = shalt.err (!%p882_p5)
}
  0x20   : > { %s886_s9 = scalar_lea.vmem %s159_s26, 8192  ;;  %p894_p1 = scmp.lt.s32.totalorder %s159_s26, %s159_s26 }
  0x21   : > { %p887_p7 = scmp.ne.s32.totalorder %s159_s26, %s886_s9  ;;  %p895_p4 = scmp.lt.s32.totalorder %s886_s9, %s886_s9 }
  0x23   : > { %p889_p9 = pnand %p887_p7, %p875_p12  ;;  %p896_p8 = por %p895_p4, %p894_p1 }
  0x25   : > { %p890_p6 = pneg %p889_p9 }
  0x27   : > { %p897_p2 = pnand %p896_p8, %p890_p6 }
  0x29   : > { %900 = shalt.err (!%p897_p2)
}
  0x2a   : > { %s1020_s10 = smov 256   ;;  %s1021_s11 = smov 16  }
  0x2b   : > { %807 = dma.hbm_to_vmem [thread:$0]  (!%p1108_p10), %s1382_s1, 8192, %s159_s26, [#allocation6], %s1020_s10, %s1020_s10, %s1021_s11  }
  0x2c   : > { %p34_p1 = scmp.ge.s32.totalorder %s32_s28, 4  ;;  %s39_s25 = sadd.s32 1, %s1005_s14 }
  0x2d   : > { %p46_p2 = scmp.ne.s32.totalorder %s1005_s14, %s1001_s13  ;;  %p47_p4 = scmp.eq.s32.totalorder %s1017_s17, 0 }
  0x2e   : > { %s1409_s28 = smov (%p34_p1, %s32_s28), 0  ;;  %p1396_p8 = scmp.ne.s32.totalorder %s1390_s21, 0 }
  0x2f   : > { %p1138_p6 = por %p47_p4, %p46_p2  ;;  %s36_s30 = ssub.s32 %s1013_s16, %s1409_s28 }
  0x30   : > { %p1144_p11 = por %p1396_p8, %p46_p2  ;;  %p817_p12 = scmp.lt.s32.totalorder %s1017_s17, 4 }
  0x31   : > { %p37_p10 = scmp.eq.s32.totalorder %s36_s30, 0  ;;  %s180_s26 = sand.u32 1, %s1005_s14  }
  0x32   : > { %s682_s4 = sshll.u32 %s180_s26, 8  ;;  %s697_s6 = sshll.u32 %s1013_s16, 12 }
  0x33   : > { %s1153_s5 = scalar_select %p37_p10, %s1005_s14, %s39_s25  }
  0x34   : > { %s1159_s9 = scalar_lea.hbm %s1381_s0, %s697_s6  ;;  %s184_s21 = scalar_lea.vmem [#allocation2], %s682_s4 }
  0x35   : > { %s192_s18 = sshll.u32 %s184_s21, 4  ;;  %p1165_p13 = pnand %p817_p12, %p1138_p6  ;;  %s1161_s18 = int_to_ptr.vmem [resolvable:$true] %s192_s18 }
  0x36   : > { %s1169_s25 = scalar_lea.sflag [#allocation3], %s180_s26  ;;  %s901_s30 = scalar_lea.hbm %s1159_s9, 4096 }
  0x37   : > { %p902_p0 = scmp.ne.s32.totalorder %s1159_s9, %s901_s30  ;;  %p903_p3 = pneg %p1165_p13 }
  0x38   : > { %s906_s29 = scalar_lea.hbm %s1381_s0, 16384  ;;  %p907_p9 = scmp.lt.u32.totalorder %s1159_s9, %s1381_s0 }
  0x39   : > { %p904_p5 = pnand %p903_p3, %p902_p0  ;;  %p908_p1 = scmp.lt.u32.totalorder %s906_s29, %s901_s30 }
  0x3a   : > { %p910_p4 = scmp.lt.u32.totalorder %s901_s30, %s1159_s9 }
  0x3b   : > { %p905_p7 = pneg %p904_p5  ;;  %p909_p2 = por %p908_p1, %p907_p9 }
  0x3d   : > { %p911_p6 = por %p910_p4, %p909_p2 }
  0x3f   : > { %p912_p8 = pnand %p911_p6, %p905_p7 }
  0x41   : > { %915 = shalt.err (!%p912_p8)
}
  0x42   : > { %s916_s26 = scalar_lea.vmem %s1161_s18, 4096  ;;  %s1022_s21 = smov [#allocation2]  }
  0x43   : > { %p917_p12 = scmp.ne.s32.totalorder %s1161_s18, %s916_s26  ;;  %s921_s4 = sshll.u32 %s1022_s21, 4  ;;  %s922_s4 = int_to_ptr.vmem [resolvable:$false] %s921_s4 }
  0x44   : > { %s923_s6 = scalar_lea.vmem %s922_s4, 8192  ;;  %p924_p5 = scmp.lt.s32.totalorder %s1161_s18, %s922_s4 }
  0x45   : > { %p919_p10 = pnand %p917_p12, %p903_p3  ;;  %p925_p9 = scmp.lt.s32.totalorder %s923_s6, %s916_s26 }
  0x47   : > { %p920_p0 = pneg %p919_p10  ;;  %p926_p1 = por %p925_p9, %p924_p5 }
  0x49   : > { %p927_p2 = pnand %p926_p1, %p920_p0 }
  0x4b   : > { %930 = shalt.err (!%p927_p2)
}
  0x4c   : > { %811 = dma.hbm_to_vmem [thread:$0]  (!%p1165_p13), %s1159_s9, 4096, %s1161_s18, %s1169_s25, %s1020_s10, %s1020_s10, %s1021_s11  }
  0x4d   : > { %p1399_p3 = scmp.ne.s32.totalorder %s1393_s24, 0 }
  0x4e   : > { %s1203_s30 = sand.u32 (!%p1399_p3), 1, %s1001_s13   ;;  %p1400_p7 = scmp.ne.s32.totalorder (!%p1399_p3), %s1391_s22, 0 }
  0x4f   : > { %204 = sbr.rel (%p1399_p3) target bundleno = 415 (0x19f), region = 32  ;;  %s687_s29 = sshll.u32 (!%p1399_p3), %s1203_s30, 8 }
  0x50   : > { %s207_s7 = scalar_lea.sflag (!%p1399_p3), [#allocation3], %s1203_s30  ;;  %s1209_s19 = scalar_lea.vmem (!%p1399_p3), [#allocation2], %s687_s29 }
  0x56   : > { %984 = dma.done.wait (%p1400_p7), %s207_s7, 4096  }
  0x57   : > { %986 = vsyncadd (%p1400_p7), %s207_s7, 4294963200  ;;  %p1401_p13 = scmp.ne.s32.totalorder %s1389_s20, 0 }
  0x59   : > { %988 = dma.done.wait (%p1401_p13), [#allocation6], 8192  }
  0x5a   : > { %990 = vsyncadd (%p1401_p13), [#allocation6], 4294959104  ;;  %v283_v0 = vld [vmem:[#allocation5 + $0x8] sm:$0xff]  ;;  %v285_v1 = vld [vmem:[#allocation5 + $0x18] sm:$0xff]  ;;  %s1264_s24 = scalar_lea.vmem [#allocation7], %s687_s29  ;;  %s699_s10 = sshll.u32 %s1009_s15, 12 }
  0x5b   : > { %v282_v2 = vld [vmem:[#allocation5] sm:$0xff]  ;;  %v700_v3 = vpack.c.bf16 %v285_v1, %v283_v0  ;;  %v284_v4 = vld [vmem:[#allocation5 + $0x10] sm:$0xff]  ;;  %v287_v5 = vld [vmem:[#allocation5 + $0x28] sm:$0xff]  ;;  %s568_s11 = sshll.u32 %s1264_s24, 4  ;;  %s1325_s18 = scalar_lea.hbm %s1384_s3, %s699_s10  ;;  %s1327_s11 = int_to_ptr.vmem [resolvable:$true] %s568_s11 }
  0x5c   : > { %v289_v6 = vld [vmem:[#allocation5 + $0x38] sm:$0xff]  ;;  %v702_v7 = vpack.c.bf16 %v284_v4, %v282_v2  ;;  %v286_v9 = vld [vmem:[#allocation5 + $0x20] sm:$0xff]  ;;  %v288_v10 = vld [vmem:[#allocation5 + $0x30] sm:$0xff]  ;;  %s552_s25 = scalar_lea.sflag [#allocation4], %s1203_s30  ;;  %s931_s8 = scalar_lea.vmem %s1327_s11, 4096 }
  0x5d   : > { %v704_v8 = vpack.c.bf16 %v289_v6, %v287_v5  ;;  %v291_v11 = vld [vmem:[#allocation5 + $0x48] sm:$0xff]  ;;  %701 = vmatprep.subr.bf16.mxu0 %v700_v3  ;;  %764 = vmatprep.subr.bf16.mxu1 %v700_v3  ;;  %v293_v12 = vld [vmem:[#allocation5 + $0x58] sm:$0xff]  ;;  %v706_v13 = vpack.c.bf16 %v288_v10, %v286_v9  ;;  %v290_v15 = vld [vmem:[#allocation5 + $0x40] sm:$0xff]  ;;  %p932_p4 = scmp.ne.s32.totalorder %s1327_s11, %s931_s8  ;;  %s1023_s26 = smov [#allocation7]  }
  0x5e   : > { %703 = vmatpush1.bf16.msra.mxu0 %v702_v7  ;;  %780 = vmatpush1.bf16.msra.mxu1 %v702_v7  ;;  %v708_v14 = vpack.c.bf16 %v293_v12, %v291_v11  ;;  %v292_v16 = vld [vmem:[#allocation5 + $0x50] sm:$0xff]  ;;  %v295_v17 = vld [vmem:[#allocation5 + $0x68] sm:$0xff]  ;;  %v297_v18 = vld [vmem:[#allocation5 + $0x78] sm:$0xff]  ;;  %s935_s21 = sshll.u32 %s1023_s26, 4  ;;  %s936_s21 = int_to_ptr.vmem [resolvable:$false] %s935_s21 }
  0x5f   : > { %705 = vmatprep.subr.bf16.mxu0 %v704_v8  ;;  %765 = vmatprep.subr.bf16.mxu1 %v704_v8  ;;  %v710_v19 = vpack.c.bf16 %v292_v16, %v290_v15  ;;  %v712_v20 = vpack.c.bf16 %v297_v18, %v295_v17  ;;  %v294_v21 = vld [vmem:[#allocation5 + $0x60] sm:$0xff]  ;;  %v296_v22 = vld [vmem:[#allocation5 + $0x70] sm:$0xff]  ;;  %v299_v23 = vld [vmem:[#allocation5 + $0x88] sm:$0xff]  ;;  %p933_p6 = pnand %p932_p4, %p1144_p11  ;;  %s937_s4 = scalar_lea.vmem %s936_s21, 8192 }
  0x60   : > { %v301_v24 = vld [vmem:[#allocation5 + $0x98] sm:$0xff]  ;;  %v714_v25 = vpack.c.bf16 %v296_v22, %v294_v21  ;;  %v298_v27 = vld [vmem:[#allocation5 + $0x80] sm:$0xff]  ;;  %v300_v28 = vld [vmem:[#allocation5 + $0x90] sm:$0xff]  ;;  %p938_p12 = scmp.lt.s32.totalorder %s1327_s11, %s936_s21  ;;  %p939_p10 = scmp.lt.s32.totalorder %s937_s4, %s931_s8 }
  0x61   : > { %v716_v26 = vpack.c.bf16 %v301_v24, %v299_v23  ;;  %v303_v29 = vld [vmem:[#allocation5 + $0xa8] sm:$0xff]  ;;  %v305_v30 = vld [vmem:[#allocation5 + $0xb8] sm:$0xff]  ;;  %v718_v31 = vpack.c.bf16 %v300_v28, %v298_v27  ;;  %v302_v33 = vld [vmem:[#allocation5 + $0xa0] sm:$0xff]  ;;  %p934_p8 = pneg %p933_p6 }
  0x62   : > { %707 = vmatpush1.bf16.msra.mxu0 %v706_v13  ;;  %781 = vmatpush1.bf16.msra.mxu1 %v706_v13  ;;  %v720_v32 = vpack.c.bf16 %v305_v30, %v303_v29  ;;  %v304_v34 = vld [vmem:[#allocation5 + $0xb0] sm:$0xff]  ;;  %v307_v35 = vld [vmem:[#allocation5 + $0xc8] sm:$0xff]  ;;  %v309_v36 = vld [vmem:[#allocation5 + $0xd8] sm:$0xff]  ;;  %p940_p0 = por %p939_p10, %p938_p12 }
  0x63   : > { %709 = vmatprep.subr.bf16.mxu0 %v708_v14  ;;  %766 = vmatprep.subr.bf16.mxu1 %v708_v14  ;;  %v722_v37 = vpack.c.bf16 %v304_v34, %v302_v33  ;;  %v306_v38 = vld [vmem:[#allocation5 + $0xc0] sm:$0xff]  ;;  %v724_v39 = vpack.c.bf16 %v309_v36, %v307_v35  ;;  %v308_v40 = vld [vmem:[#allocation5 + $0xd0] sm:$0xff]  ;;  %v251_v41 = vld [vmem:[%s1209_s19 + $0x8] sm:$0xff] }
  0x64   : > { %v267_v42 = vld [vmem:[%s1209_s19 + $0x88] sm:$0xff]  ;;  %v313_v44 = vld [vmem:[#allocation5 + $0xf8] sm:$0xff]  ;;  %422 = vmatprep.mubr.f32.mxu0 %v251_v41  ;;  %v726_v45 = vpack.c.bf16 %v308_v40, %v306_v38  ;;  %v310_v47 = vld [vmem:[#allocation5 + $0xe0] sm:$0xff]  ;;  %p941_p5 = pnand %p940_p0, %p934_p8 }
  0x65   : > { %v311_v43 = vld [vmem:[#allocation5 + $0xe8] sm:$0xff]  ;;  %470 = vmatprep.mubr.f32.mxu1 %v267_v42  ;;  %v312_v48 = vld [vmem:[#allocation5 + $0xf0] sm:$0xff]  ;;  %v317_v50 = vld [vmem:[#allocation5 + $0x118] sm:$0xff] }
  0x66   : > { %711 = vmatpush1.bf16.msra.mxu0 %v710_v19  ;;  %782 = vmatpush1.bf16.msra.mxu1 %v710_v19  ;;  %v728_v46 = vpack.c.bf16 %v313_v44, %v311_v43  ;;  %v315_v49 = vld [vmem:[#allocation5 + $0x108] sm:$0xff]  ;;  %v730_v51 = vpack.c.bf16 %v312_v48, %v310_v47  ;;  %v314_v53 = vld [vmem:[#allocation5 + $0x100] sm:$0xff]  ;;  %v316_v54 = vld [vmem:[#allocation5 + $0x110] sm:$0xff] }
  0x67   : > { %713 = vmatprep.subr.bf16.mxu0 %v712_v20  ;;  %767 = vmatprep.subr.bf16.mxu1 %v712_v20  ;;  %v732_v52 = vpack.c.bf16 %v317_v50, %v315_v49  ;;  %v319_v55 = vld [vmem:[#allocation5 + $0x128] sm:$0xff]  ;;  %v321_v56 = vld [vmem:[#allocation5 + $0x138] sm:$0xff]  ;;  %v734_v57 = vpack.c.bf16 %v316_v54, %v314_v53  ;;  %v318_v59 = vld [vmem:[#allocation5 + $0x120] sm:$0xff] }
  0x68   : > { %v736_v58 = vpack.c.bf16 %v321_v56, %v319_v55  ;;  %v320_v60 = vld [vmem:[#allocation5 + $0x130] sm:$0xff]  ;;  %v323_v61 = vld [vmem:[#allocation5 + $0x148] sm:$0xff]  ;;  %v325_v62 = vld [vmem:[#allocation5 + $0x158] sm:$0xff] }
  0x69   : > { %v738_v63 = vpack.c.bf16 %v320_v60, %v318_v59  ;;  %v740_v0 = vpack.c.bf16 %v325_v62, %v323_v61  ;;  %v322_v1 = vld [vmem:[#allocation5 + $0x140] sm:$0xff]  ;;  %v324_v2 = vld [vmem:[#allocation5 + $0x150] sm:$0xff]  ;;  %v327_v3 = vld [vmem:[#allocation5 + $0x168] sm:$0xff] }
  0x6a   : > { %715 = vmatpush1.bf16.msra.mxu0 %v714_v25  ;;  %783 = vmatpush1.bf16.msra.mxu1 %v714_v25  ;;  %v329_v4 = vld [vmem:[#allocation5 + $0x178] sm:$0xff]  ;;  %v742_v5 = vpack.c.bf16 %v324_v2, %v322_v1  ;;  %v326_v7 = vld [vmem:[#allocation5 + $0x160] sm:$0xff]  ;;  %v328_v8 = vld [vmem:[#allocation5 + $0x170] sm:$0xff] }
  0x6b   : > { %717 = vmatprep.subr.bf16.mxu0 %v716_v26  ;;  %768 = vmatprep.subr.bf16.mxu1 %v716_v26  ;;  %v744_v6 = vpack.c.bf16 %v329_v4, %v327_v3  ;;  %v331_v9 = vld [vmem:[#allocation5 + $0x188] sm:$0xff]  ;;  %v333_v10 = vld [vmem:[#allocation5 + $0x198] sm:$0xff]  ;;  %v746_v11 = vpack.c.bf16 %v328_v8, %v326_v7  ;;  %v330_v13 = vld [vmem:[#allocation5 + $0x180] sm:$0xff] }
  0x6c   : > { %v748_v12 = vpack.c.bf16 %v333_v10, %v331_v9  ;;  %v332_v14 = vld [vmem:[#allocation5 + $0x190] sm:$0xff]  ;;  %v335_v15 = vld [vmem:[#allocation5 + $0x1a8] sm:$0xff]  ;;  %v337_v16 = vld [vmem:[#allocation5 + $0x1b8] sm:$0xff] }
  0x6d   : > { %v750_v17 = vpack.c.bf16 %v332_v14, %v330_v13  ;;  %v752_v18 = vpack.c.bf16 %v337_v16, %v335_v15  ;;  %v334_v19 = vld [vmem:[#allocation5 + $0x1a0] sm:$0xff]  ;;  %v336_v20 = vld [vmem:[#allocation5 + $0x1b0] sm:$0xff]  ;;  %v339_v21 = vld [vmem:[#allocation5 + $0x1c8] sm:$0xff] }
  0x6e   : > { %719 = vmatpush1.bf16.msra.mxu0 %v718_v31  ;;  %784 = vmatpush1.bf16.msra.mxu1 %v718_v31  ;;  %v341_v22 = vld [vmem:[#allocation5 + $0x1d8] sm:$0xff]  ;;  %v754_v23 = vpack.c.bf16 %v336_v20, %v334_v19  ;;  %v338_v25 = vld [vmem:[#allocation5 + $0x1c0] sm:$0xff]  ;;  %v340_v26 = vld [vmem:[#allocation5 + $0x1d0] sm:$0xff] }
  0x6f   : > { %721 = vmatprep.subr.bf16.mxu0 %v720_v32  ;;  %769 = vmatprep.subr.bf16.mxu1 %v720_v32  ;;  %v756_v24 = vpack.c.bf16 %v341_v22, %v339_v21  ;;  %v343_v27 = vld [vmem:[#allocation5 + $0x1e8] sm:$0xff]  ;;  %v345_v28 = vld [vmem:[#allocation5 + $0x1f8] sm:$0xff]  ;;  %v758_v29 = vpack.c.bf16 %v340_v26, %v338_v25  ;;  %v342_v31 = vld [vmem:[#allocation5 + $0x1e0] sm:$0xff] }
  0x70   : > { %v760_v30 = vpack.c.bf16 %v345_v28, %v343_v27  ;;  %v344_v32 = vld [vmem:[#allocation5 + $0x1f0] sm:$0xff]  ;;  %v250_v34 = vld [vmem:[%s1209_s19] sm:$0xff]  ;;  %v253_v36 = vld [vmem:[%s1209_s19 + $0x18] sm:$0xff] }
  0x71   : > { %v762_v33 = vpack.c.bf16 %v344_v32, %v342_v31  ;;  %v266_v35 = vld [vmem:[%s1209_s19 + $0x80] sm:$0xff]  ;;  %v252_v38 = vld [vmem:[%s1209_s19 + $0x10] sm:$0xff]  ;;  %v255_v40 = vld [vmem:[%s1209_s19 + $0x28] sm:$0xff] }
  0x72   : > { %723 = vmatpush1.bf16.msra.mxu0 %v722_v37  ;;  %785 = vmatpush1.bf16.msra.mxu1 %v722_v37  ;;  %v269_v37 = vld [vmem:[%s1209_s19 + $0x98] sm:$0xff]  ;;  %v271_v41 = vld [vmem:[%s1209_s19 + $0xa8] sm:$0xff]  ;;  %v254_v42 = vld [vmem:[%s1209_s19 + $0x20] sm:$0xff] }
  0x73   : > { %725 = vmatprep.subr.bf16.mxu0 %v724_v39  ;;  %770 = vmatprep.subr.bf16.mxu1 %v724_v39  ;;  %v268_v39 = vld [vmem:[%s1209_s19 + $0x90] sm:$0xff]  ;;  %v270_v43 = vld [vmem:[%s1209_s19 + $0xa0] sm:$0xff]  ;;  %v257_v44 = vld [vmem:[%s1209_s19 + $0x38] sm:$0xff] }
  0x74   : > { %v272_v47 = vld [vmem:[%s1209_s19 + $0xb0] sm:$0xff]  ;;  %v259_v48 = vld [vmem:[%s1209_s19 + $0x48] sm:$0xff]  ;;  %v258_v50 = vld [vmem:[%s1209_s19 + $0x40] sm:$0xff] }
  0x75   : > { %v275_v49 = vld [vmem:[%s1209_s19 + $0xc8] sm:$0xff]  ;;  %v277_v53 = vld [vmem:[%s1209_s19 + $0xd8] sm:$0xff]  ;;  %v260_v54 = vld [vmem:[%s1209_s19 + $0x50] sm:$0xff] }
  0x76   : > { %727 = vmatpush1.bf16.msra.mxu0 %v726_v45  ;;  %786 = vmatpush1.bf16.msra.mxu1 %v726_v45  ;;  %v273_v45 = vld [vmem:[%s1209_s19 + $0xb8] sm:$0xff]  ;;  %v276_v55 = vld [vmem:[%s1209_s19 + $0xd0] sm:$0xff]  ;;  %v263_v56 = vld [vmem:[%s1209_s19 + $0x68] sm:$0xff] }
  0x77   : > { %729 = vmatprep.subr.bf16.mxu0 %v728_v46  ;;  %771 = vmatprep.subr.bf16.mxu1 %v728_v46  ;;  %v256_v46 = vld [vmem:[%s1209_s19 + $0x30] sm:$0xff]  ;;  %v278_v59 = vld [vmem:[%s1209_s19 + $0xe0] sm:$0xff]  ;;  %v265_v60 = vld [vmem:[%s1209_s19 + $0x78] sm:$0xff] }
  0x78   : > { %v281_v61 = vld [vmem:[%s1209_s19 + $0xf8] sm:$0xff]  ;;  %v264_v62 = vld [vmem:[%s1209_s19 + $0x70] sm:$0xff]  ;;  %v346_v3 = vld [vmem:[%s1383_s2] sm:$0x3] }
  0x7a   : > { %731 = vmatpush1.bf16.msra.mxu0 %v730_v51  ;;  %787 = vmatpush1.bf16.msra.mxu1 %v730_v51  ;;  %v274_v51 = vld [vmem:[%s1209_s19 + $0xc0] sm:$0xff] }
  0x7b   : > { %733 = vmatprep.subr.bf16.mxu0 %v732_v52  ;;  %772 = vmatprep.subr.bf16.mxu1 %v732_v52  ;;  %v261_v52 = vld [vmem:[%s1209_s19 + $0x58] sm:$0xff] }
  0x7e   : > { %735 = vmatpush1.bf16.msra.mxu0 %v734_v57  ;;  %788 = vmatpush1.bf16.msra.mxu1 %v734_v57  ;;  %v279_v57 = vld [vmem:[%s1209_s19 + $0xe8] sm:$0xff] }
  0x7f   : > { %737 = vmatprep.subr.bf16.mxu0 %v736_v58  ;;  %773 = vmatprep.subr.bf16.mxu1 %v736_v58  ;;  %v262_v58 = vld [vmem:[%s1209_s19 + $0x60] sm:$0xff] }
  0x82   : > { %739 = vmatpush1.bf16.msra.mxu0 %v738_v63  ;;  %789 = vmatpush1.bf16.msra.mxu1 %v738_v63  ;;  %v280_v63 = vld [vmem:[%s1209_s19 + $0xf0] sm:$0xff] }
  0x83   : > { %741 = vmatprep.subr.bf16.mxu0 %v740_v0  ;;  %774 = vmatprep.subr.bf16.mxu1 %v740_v0  ;;  %v348_v0 = vlaneseq }
  0x85   : > { %v349_v1 = vshrl.u32 %v348_v0, 7 }
  0x86   : > { %743 = vmatpush1.bf16.msra.mxu0 %v742_v5  ;;  %790 = vmatpush1.bf16.msra.mxu1 %v742_v5 }
  0x87   : > { %745 = vmatprep.subr.bf16.mxu0 %v744_v6  ;;  %775 = vmatprep.subr.bf16.mxu1 %v744_v6  ;;  %v350_v2 = vsub.s32 0, %v349_v1  ;;  %v354_v4 = vsub.s32 1, %v349_v1 }
  0x89   : > { %v1254_v5 = vrot.slane %v346_v3, %v350_v2  ;;  %v1256_v6 = vrot.slane %v346_v3, %v354_v4 }
  0x8a   : > { %747 = vmatpush1.bf16.msra.mxu0 %v746_v11  ;;  %791 = vmatpush1.bf16.msra.mxu1 %v746_v11 }
  0x8b   : > { %749 = vmatprep.subr.bf16.mxu0 %v748_v12  ;;  %776 = vmatprep.subr.bf16.mxu1 %v748_v12 }
  0x8e   : > { %751 = vmatpush1.bf16.msra.mxu0 %v750_v17  ;;  %792 = vmatpush1.bf16.msra.mxu1 %v750_v17 }
  0x8f   : > { %753 = vmatprep.subr.bf16.mxu0 %v752_v18  ;;  %777 = vmatprep.subr.bf16.mxu1 %v752_v18 }
  0x92   : > { %755 = vmatpush1.bf16.msra.mxu0 %v754_v23  ;;  %793 = vmatpush1.bf16.msra.mxu1 %v754_v23 }
  0x93   : > { %757 = vmatprep.subr.bf16.mxu0 %v756_v24  ;;  %778 = vmatprep.subr.bf16.mxu1 %v756_v24 }
  0x96   : > { %759 = vmatpush1.bf16.msra.mxu0 %v758_v29  ;;  %794 = vmatpush1.bf16.msra.mxu1 %v758_v29 }
  0x97   : > { %761 = vmatprep.subr.bf16.mxu0 %v760_v30  ;;  %779 = vmatprep.subr.bf16.mxu1 %v760_v30 }
  0x9a   : > { %763 = vmatpush1.bf16.msra.mxu0 %v762_v33  ;;  %795 = vmatpush1.bf16.msra.mxu1 %v762_v33 }
  0x9d   : > { %423 = vmatmul.mubr.f32.vlgmr.msra.gmra.mrb[0].mxu0 %v250_v34  ;;  %471 = vmatmul.mubr.f32.vlgmr.msra.gmra.mrb[0].mxu1 %v266_v35 }
  0x9e   : > { %428 = vmatprep.mubr.f32.mxu0 %v253_v36  ;;  %476 = vmatprep.mubr.f32.mxu1 %v269_v37 }
  0xa1   : > { %429 = vmatmul.mubr.f32.gmra.mrb[2].mxu0 %v252_v38  ;;  %477 = vmatmul.mubr.f32.gmra.mrb[2].mxu1 %v268_v39 }
  0xa2   : > { %434 = vmatprep.mubr.f32.mxu0 %v255_v40  ;;  %482 = vmatprep.mubr.f32.mxu1 %v271_v41 }
  0xa5   : > { %435 = vmatmul.mubr.f32.gmra.mrb[4].mxu0 %v254_v42  ;;  %483 = vmatmul.mubr.f32.gmra.mrb[4].mxu1 %v270_v43 }
  0xa6   : > { %440 = vmatprep.mubr.f32.mxu0 %v257_v44  ;;  %488 = vmatprep.mubr.f32.mxu1 %v273_v45 }
  0xa9   : > { %441 = vmatmul.mubr.f32.gmra.mrb[6].mxu0 %v256_v46  ;;  %489 = vmatmul.mubr.f32.gmra.mrb[6].mxu1 %v272_v47 }
  0xaa   : > { %446 = vmatprep.mubr.f32.mxu0 %v259_v48  ;;  %494 = vmatprep.mubr.f32.mxu1 %v275_v49 }
  0xad   : > { %447 = vmatmul.mubr.f32.gmra.mrb[8].mxu0 %v258_v50  ;;  %495 = vmatmul.mubr.f32.gmra.mrb[8].mxu1 %v274_v51 }
  0xae   : > { %452 = vmatprep.mubr.f32.mxu0 %v261_v52  ;;  %500 = vmatprep.mubr.f32.mxu1 %v277_v53 }
  0xb1   : > { %453 = vmatmul.mubr.f32.gmra.mrb[10].mxu0 %v260_v54  ;;  %501 = vmatmul.mubr.f32.gmra.mrb[10].mxu1 %v276_v55 }
  0xb2   : > { %458 = vmatprep.mubr.f32.mxu0 %v263_v56  ;;  %506 = vmatprep.mubr.f32.mxu1 %v279_v57 }
  0xb5   : > { %459 = vmatmul.mubr.f32.gmra.mrb[12].mxu0 %v262_v58  ;;  %507 = vmatmul.mubr.f32.gmra.mrb[12].mxu1 %v278_v59 }
  0xb6   : > { %464 = vmatprep.mubr.f32.mxu0 %v265_v60  ;;  %512 = vmatprep.mubr.f32.mxu1 %v281_v61 }
  0xb9   : > { %465 = vmatmul.mubr.f32.gmra.mrb[14].mxu0 %v264_v62  ;;  %513 = vmatmul.mubr.f32.gmra.mrb[14].mxu1 %v280_v63 }
 0x170   : > { %v424_v7 = vpop.f32.mrb[0].mxu0  ;;  %v472_v8 = vpop.f32.mrb[0].mxu1 }
 0x171   : > { %v425_v9 = vadd.f32 %v424_v7, %v1254_v5  ;;  %v473_v10 = vadd.f32 %v472_v8, %v1254_v5  ;;  %v426_v11 = vpop.f32.mrb[1].mxu0  ;;  %v474_v12 = vpop.f32.mrb[1].mxu1 }
 0x172   : > { %v427_v13 = vadd.f32 %v426_v11, %v1256_v6  ;;  %v475_v14 = vadd.f32 %v474_v12, %v1256_v6 }
 0x173   : > { %519 = vst [vmem:[%s1264_s24] sm:$0xff] %v425_v9  ;;  %535 = vst [vmem:[%s1264_s24 + $0x80] sm:$0xff] %v473_v10 }
 0x174   : > { %520 = vst [vmem:[%s1264_s24 + $0x8] sm:$0xff] %v427_v13  ;;  %536 = vst [vmem:[%s1264_s24 + $0x88] sm:$0xff] %v475_v14  ;;  %v430_v15 = vpop.f32.mrb[2].mxu0  ;;  %v478_v16 = vpop.f32.mrb[2].mxu1 }
 0x175   : > { %v431_v17 = vadd.f32 %v430_v15, %v1254_v5  ;;  %v479_v18 = vadd.f32 %v478_v16, %v1254_v5  ;;  %v432_v19 = vpop.f32.mrb[3].mxu0  ;;  %v480_v20 = vpop.f32.mrb[3].mxu1 }
 0x176   : > { %v433_v21 = vadd.f32 %v432_v19, %v1256_v6  ;;  %v481_v22 = vadd.f32 %v480_v20, %v1256_v6 }
 0x177   : > { %521 = vst [vmem:[%s1264_s24 + $0x10] sm:$0xff] %v431_v17  ;;  %537 = vst [vmem:[%s1264_s24 + $0x90] sm:$0xff] %v479_v18 }
 0x178   : > { %522 = vst [vmem:[%s1264_s24 + $0x18] sm:$0xff] %v433_v21  ;;  %538 = vst [vmem:[%s1264_s24 + $0x98] sm:$0xff] %v481_v22  ;;  %v436_v23 = vpop.f32.mrb[4].mxu0  ;;  %v484_v24 = vpop.f32.mrb[4].mxu1 }
 0x179   : > { %v437_v25 = vadd.f32 %v436_v23, %v1254_v5  ;;  %v485_v26 = vadd.f32 %v484_v24, %v1254_v5  ;;  %v438_v27 = vpop.f32.mrb[5].mxu0  ;;  %v486_v28 = vpop.f32.mrb[5].mxu1 }
 0x17a   : > { %v439_v29 = vadd.f32 %v438_v27, %v1256_v6  ;;  %v487_v30 = vadd.f32 %v486_v28, %v1256_v6 }
 0x17b   : > { %523 = vst [vmem:[%s1264_s24 + $0x20] sm:$0xff] %v437_v25  ;;  %539 = vst [vmem:[%s1264_s24 + $0xa0] sm:$0xff] %v485_v26 }
 0x17c   : > { %524 = vst [vmem:[%s1264_s24 + $0x28] sm:$0xff] %v439_v29  ;;  %540 = vst [vmem:[%s1264_s24 + $0xa8] sm:$0xff] %v487_v30  ;;  %v442_v31 = vpop.f32.mrb[6].mxu0  ;;  %v490_v32 = vpop.f32.mrb[6].mxu1 }
 0x17d   : > { %v443_v33 = vadd.f32 %v442_v31, %v1254_v5  ;;  %v491_v34 = vadd.f32 %v490_v32, %v1254_v5  ;;  %v444_v35 = vpop.f32.mrb[7].mxu0  ;;  %v492_v36 = vpop.f32.mrb[7].mxu1 }
 0x17e   : > { %v445_v37 = vadd.f32 %v444_v35, %v1256_v6  ;;  %v493_v38 = vadd.f32 %v492_v36, %v1256_v6 }
 0x17f   : > { %525 = vst [vmem:[%s1264_s24 + $0x30] sm:$0xff] %v443_v33  ;;  %541 = vst [vmem:[%s1264_s24 + $0xb0] sm:$0xff] %v491_v34 }
 0x180   : > { %526 = vst [vmem:[%s1264_s24 + $0x38] sm:$0xff] %v445_v37  ;;  %542 = vst [vmem:[%s1264_s24 + $0xb8] sm:$0xff] %v493_v38  ;;  %v448_v39 = vpop.f32.mrb[8].mxu0  ;;  %v496_v40 = vpop.f32.mrb[8].mxu1 }
 0x181   : > { %v449_v41 = vadd.f32 %v448_v39, %v1254_v5  ;;  %v497_v42 = vadd.f32 %v496_v40, %v1254_v5  ;;  %v450_v43 = vpop.f32.mrb[9].mxu0  ;;  %v498_v44 = vpop.f32.mrb[9].mxu1 }
 0x182   : > { %v451_v45 = vadd.f32 %v450_v43, %v1256_v6  ;;  %v499_v46 = vadd.f32 %v498_v44, %v1256_v6 }
 0x183   : > { %527 = vst [vmem:[%s1264_s24 + $0x40] sm:$0xff] %v449_v41  ;;  %543 = vst [vmem:[%s1264_s24 + $0xc0] sm:$0xff] %v497_v42 }
 0x184   : > { %528 = vst [vmem:[%s1264_s24 + $0x48] sm:$0xff] %v451_v45  ;;  %544 = vst [vmem:[%s1264_s24 + $0xc8] sm:$0xff] %v499_v46  ;;  %v454_v47 = vpop.f32.mrb[10].mxu0  ;;  %v502_v48 = vpop.f32.mrb[10].mxu1 }
 0x185   : > { %v455_v49 = vadd.f32 %v454_v47, %v1254_v5  ;;  %v503_v50 = vadd.f32 %v502_v48, %v1254_v5  ;;  %v456_v51 = vpop.f32.mrb[11].mxu0  ;;  %v504_v52 = vpop.f32.mrb[11].mxu1 }
 0x186   : > { %v457_v53 = vadd.f32 %v456_v51, %v1256_v6  ;;  %v505_v54 = vadd.f32 %v504_v52, %v1256_v6 }
 0x187   : > { %529 = vst [vmem:[%s1264_s24 + $0x50] sm:$0xff] %v455_v49  ;;  %545 = vst [vmem:[%s1264_s24 + $0xd0] sm:$0xff] %v503_v50 }
 0x188   : > { %530 = vst [vmem:[%s1264_s24 + $0x58] sm:$0xff] %v457_v53  ;;  %546 = vst [vmem:[%s1264_s24 + $0xd8] sm:$0xff] %v505_v54  ;;  %v460_v55 = vpop.f32.mrb[12].mxu0  ;;  %v508_v56 = vpop.f32.mrb[12].mxu1 }
 0x189   : > { %v461_v57 = vadd.f32 %v460_v55, %v1254_v5  ;;  %v509_v58 = vadd.f32 %v508_v56, %v1254_v5  ;;  %v462_v59 = vpop.f32.mrb[13].mxu0  ;;  %v510_v60 = vpop.f32.mrb[13].mxu1 }
 0x18a   : > { %v463_v61 = vadd.f32 %v462_v59, %v1256_v6  ;;  %v511_v62 = vadd.f32 %v510_v60, %v1256_v6 }
 0x18b   : > { %531 = vst [vmem:[%s1264_s24 + $0x60] sm:$0xff] %v461_v57  ;;  %547 = vst [vmem:[%s1264_s24 + $0xe0] sm:$0xff] %v509_v58 }
 0x18c   : > { %532 = vst [vmem:[%s1264_s24 + $0x68] sm:$0xff] %v463_v61  ;;  %548 = vst [vmem:[%s1264_s24 + $0xe8] sm:$0xff] %v511_v62  ;;  %v466_v63 = vpop.f32.mrb[14].mxu0  ;;  %v514_v0 = vpop.f32.mrb[14].mxu1 }
 0x18d   : > { %v467_v1 = vadd.f32 %v466_v63, %v1254_v5  ;;  %v515_v2 = vadd.f32 %v514_v0, %v1254_v5  ;;  %v468_v3 = vpop.f32.mrb[15].mxu0  ;;  %v516_v4 = vpop.f32.mrb[15].mxu1 }
 0x18e   : > { %v469_v7 = vadd.f32 %v468_v3, %v1256_v6  ;;  %v517_v8 = vadd.f32 %v516_v4, %v1256_v6 }
 0x18f   : > { %533 = vst [vmem:[%s1264_s24 + $0x70] sm:$0xff] %v467_v1  ;;  %549 = vst [vmem:[%s1264_s24 + $0xf0] sm:$0xff] %v515_v2 }
 0x190   : > { %534 = vst [vmem:[%s1264_s24 + $0x78] sm:$0xff] %v469_v7  ;;  %550 = vst [vmem:[%s1264_s24 + $0xf8] sm:$0xff] %v517_v8 }
 0x191   : > { %944 = shalt.err (!%p941_p5)
}
 0x192   : > { %s945_s6 = scalar_lea.hbm %s1325_s18, 4096  ;;  %s949_s19 = scalar_lea.hbm %s1384_s3, 16384 }
 0x193   : > { %p946_p9 = scmp.ne.s32.totalorder %s1325_s18, %s945_s6  ;;  %p950_p3 = scmp.lt.u32.totalorder %s1325_s18, %s1384_s3 }
 0x194   : > { %p951_p7 = scmp.lt.u32.totalorder %s949_s19, %s945_s6  ;;  %p953_p4 = scmp.lt.u32.totalorder %s945_s6, %s1325_s18 }
 0x195   : > { %p947_p1 = pnand %p946_p9, %p1144_p11 }
 0x196   : > { %p952_p13 = por %p951_p7, %p950_p3 }
 0x197   : > { %p948_p2 = pneg %p947_p1 }
 0x198   : > { %p954_p6 = por %p953_p4, %p952_p13 }
 0x19a   : > { %p955_p8 = pnand %p954_p6, %p948_p2 }
 0x19c   : > { %958 = shalt.err (!%p955_p8)
}
 0x19d   : > { %s1024_s24 = smov 256   ;;  %s1025_s10 = smov 16  }
 0x19e   : > { %802 = dma.vmem_to_hbm [thread:$0]  (%p1144_p11), %s1327_s11, 4096, %s1325_s18, %s552_s25, %s1024_s24, %s1024_s24, %s1025_s10  }
 0x19f PF: > { %p819_p12 = scmp.ge.s32.totalorder %s1017_s17, 2  ;;  %s583_s15 = sand.u32 1, %s997_s12  }
 0x1a0   : > { %p1402_p10 = scmp.ne.s32.totalorder %s1392_s23, 0  ;;  %s584_s9 = scalar_lea.sflag [#allocation4], %s583_s15 }
 0x1a2   : > { %p813_p0 = pnand %p819_p12, %p1402_p10 }
 0x1a4   : > { %992 = dma.done.wait (!%p813_p0), %s584_s9, 4096  }
 0x1a5   : > { %994 = vsyncadd (!%p813_p0), %s584_s9, 4294963200  ;;  %s20_s17 = sadd.s32 1, %s1017_s17   ;;  %s1403_s12 = smov %s1001_s13 }
 0x1a6   : > { %p17_p5 = scmp.ge.s32.totalorder %s20_s17, 6   ;;  %s1404_s13 = smov %s1005_s14 }
 0x1a7   : > { %s1405_s14 = smov %s1153_s5  ;;  %s1406_s15 = smov %s1013_s16 }
 0x1a8   : > { %s1407_s16 = smov %s1409_s28  ;;  %19 = sbr.rel (!%p17_p5) target bundleno = 7 (0x7), region = 85 }
 0x1af   :  { %589 = vsyncpa [#allocation3], 1 }
 0x1b0   :  { %591 = vsyncpa [#allocation3 + $0x1], 1 }
 0x1b1   :  { %592 = vsyncpa [#allocation6], 1 }
 0x1b2   :  { %593 = vsyncpa [#allocation4], 1 }
 0x1b3   :  { %595 = vsyncpa [#allocation4 + $0x1], 1 }

</bundles_post_ra>
